<compile_context>
chip_gen: v7x
topology: tpu7x:2x2x1
jax: 0.10.0
libtpu: 0.0.40
codegen_flags: <defaults>
</compile_context>

<pallas_src>
import jax
import jax.numpy as jnp
from jax.experimental import pallas as pl
from jax.experimental.pallas import tpu as pltpu


def _make_lstm_kernel(layer_dim: int, seq_len: int, hidden: int,
                      batch: int, input_dim: int):
    """Kernel closed over static sizes.

    Ref order: x(B,T,D), h0(B,H), c0(B,H), mul_mask(1,4H), add_mask(1,4H),
               then per layer l=0..L-1: wih_T(in_l,4H), whh_T(H,4H), b(1,4H),
               then out(B,H).
    Weights arrive pre-transposed, bias-folded (bih+bhh) and pre-scaled
    (x0.5 on the i/f/o gate rows) by prepare_params().
    """
    H, L, T, B, D = hidden, layer_dim, seq_len, batch, input_dim

    def kernel(*refs):
        x_ref, h0_ref, c0_ref, mul_ref, add_ref = refs[:5]
        w_refs = refs[5:5 + 3 * L]
        out_ref = refs[5 + 3 * L]

        # ---------------- prologue: everything here is off the serial chain
        # Hoisted once: weights, folded biases, activation fix-up masks.
        wih_T = [w_refs[3 * l + 0][...] for l in range(L)]          # (in,4H)
        whh_T = [w_refs[3 * l + 1][...] for l in range(L)]          # (H, 4H)
        b_row = [w_refs[3 * l + 2][...] for l in range(L)]          # (1, 4H)
        bias_b = [None] + [jnp.broadcast_to(b_row[l], (B, 4 * H))
                           for l in range(1, L)]
        mul_mask = jnp.broadcast_to(mul_ref[...], (B, 4 * H))
        add_mask = jnp.broadcast_to(add_ref[...], (B, 4 * H))

        # Layer-0 input projection as ONE (B*T, D) @ (D, 4H) GEMM, fused into
        # the kernel (no wrapper GEMM, no xproj HBM round trip).  Layer-0 bias
        # is folded here.  Per-step rows are pre-sliced into a static list.
        x = x_ref[...]                                               # (B,T,D)
        xproj = jnp.dot(x.reshape(B * T, D), wih_T[0],
                        preferred_element_type=jnp.float32) + b_row[0]
        xp = []
        for t in range(T):
            rows = [xproj[b * T + t:b * T + t + 1, :] for b in range(B)]
            xp.append(jnp.concatenate(rows, axis=0) if B > 1 else rows[0])

        h0 = h0_ref[...]
        c0 = c0_ref[...]
        # PyTorch reuses the SAME (h0, c0) as the initial state of every layer.
        hs = [h0 for _ in range(L)]
        cs = [c0 for _ in range(L)]
        # Software pipelining: recurrent dots for step 0 issued in the prologue.
        rec = [jnp.dot(hs[l], whh_T[l], preferred_element_type=jnp.float32)
               for l in range(L)]

        def cell(gates, c_prev):
            # Single EUP push for all four gates: weights/biases were
            # pre-scaled by 0.5 on the sigmoid (i,f,o) rows, so
            #   sigmoid(z) = 0.5*tanh(z/2) + 0.5,   g stays tanh(z).
            act = jnp.tanh(gates) * mul_mask + add_mask
            i_g = act[:, 0 * H:1 * H]
            f_g = act[:, 1 * H:2 * H]
            g_g = act[:, 2 * H:3 * H]
            o_g = act[:, 3 * H:4 * H]
            c_new = f_g * c_prev + i_g * g_g
            h_new = o_g * jnp.tanh(c_new)
            return h_new, c_new

        # T and L are small and static: fully unrolled Python loops keep every
        # slice index static and let the scheduler overlap MXU/EUP work across
        # consecutive cells.
        for t in range(T):
            # Layer 0: input projection precomputed in the prologue; the
            # recurrent dot was issued at the end of step t-1 (or prologue).
            gates = xp[t] + rec[0]
            hs[0], cs[0] = cell(gates, cs[0])
            if t + 1 < T:   # issue next step's recurrent dot immediately
                rec[0] = jnp.dot(hs[0], whh_T[0],
                                 preferred_element_type=jnp.float32)
            inp = hs[0]
            for l in range(1, L):
                gates = (jnp.dot(inp, wih_T[l],
                                 preferred_element_type=jnp.float32)
                         + rec[l] + bias_b[l])
                hs[l], cs[l] = cell(gates, cs[l])
                if t + 1 < T:
                    rec[l] = jnp.dot(hs[l], whh_T[l],
                                     preferred_element_type=jnp.float32)
                inp = hs[l]

        # layers[-1] is nn.ReLU(): output = relu(h of last LSTM layer).
        out_ref[...] = jnp.maximum(hs[-1], 0.0)

    return kernel


def prepare_params(params, dtype=jnp.float32):
    """One-time (outside jit) weight preprocessing: transpose to (K, 4H),
    fold bih+bhh, and pre-scale the sigmoid-gate (i, f, o) rows by 0.5 so the
    kernel needs a single tanh per cell for the four gate activations."""
    H = params[0]["whh"].shape[1]
    half = jnp.full((H,), 0.5, dtype)
    one = jnp.ones((H,), dtype)
    zero = jnp.zeros((H,), dtype)
    scale = jnp.concatenate([half, half, one, half])            # (4H,)
    mul_mask = scale.reshape(1, 4 * H)                          # 0.5/0.5/1/0.5
    add_mask = jnp.concatenate([half, half, zero, half]).reshape(1, 4 * H)
    flat = []
    for p in params:
        wih_T = (jnp.asarray(p["wih"], dtype) * scale[:, None]).T   # (in, 4H)
        whh_T = (jnp.asarray(p["whh"], dtype) * scale[:, None]).T   # (H,  4H)
        b = ((jnp.asarray(p["bih"], dtype) + jnp.asarray(p["bhh"], dtype))
             * scale).reshape(1, 4 * H)
        flat += [wih_T, whh_T, b]
    return mul_mask, add_mask, tuple(flat)


def lstm_model2_forward(x, h0, c0, prepared):
    """x: (B, T, D) float32; prepared = prepare_params(params). The wrapper
    contains no preprocessing ops: a single pallas_call per forward."""
    mul_mask, add_mask, flat = prepared
    B, T, D = x.shape
    L = len(flat) // 3
    H = flat[1].shape[0]                      # whh_T is (H, 4H)

    kernel = _make_lstm_kernel(L, T, H, B, D)
    n_in = 5 + 3 * L
    # No grid: the whole problem (<< 1 MiB) lives in VMEM; the recurrence is a
    # pure serial chain, so grid steps / multi-core sharding would only add
    # overhead.
    return pl.pallas_call(
        kernel,
        out_shape=jax.ShapeDtypeStruct((B, H), jnp.float32),
        in_specs=[pl.BlockSpec(memory_space=pltpu.MemorySpace.VMEM)] * n_in,
        out_specs=pl.BlockSpec(memory_space=pltpu.MemorySpace.VMEM),
    )(x, h0, c0, mul_mask, add_mask, *flat)


def lstm_model2_reference(x, h0, c0, params):
    """Pure-JAX reference with the unmodified math, for a sanity check."""
    x_tm = jnp.transpose(x, (1, 0, 2))
    L = len(params)
    H = params[0]["whh"].shape[1]
    hs = [h0] * L
    cs = [c0] * L
    for t in range(x_tm.shape[0]):
        inp = x_tm[t]
        for l in range(L):
            p = params[l]
            gates = inp @ p["wih"].T + hs[l] @ p["whh"].T + p["bih"] + p["bhh"]
            i_g = jax.nn.sigmoid(gates[:, 0 * H:1 * H])
            f_g = jax.nn.sigmoid(gates[:, 1 * H:2 * H])
            g_g = jnp.tanh(gates[:, 2 * H:3 * H])
            o_g = jax.nn.sigmoid(gates[:, 3 * H:4 * H])
            cs[l] = f_g * cs[l] + i_g * g_g
            hs[l] = o_g * jnp.tanh(cs[l])
            inp = hs[l]
    return jnp.maximum(hs[-1], 0.0)


if __name__ == "__main__":
    # Small shapes consistent with the module's forward.
    B, T, D = 2, 8, 16       # batch, seq, input_dim
    H, L = 32, 2             # hidden_unit, layer_dim
    OUT_DIM = 4              # output_dim of the (unused-in-forward) Linear

    key = jax.random.PRNGKey(0)
    keys = jax.random.split(key, 4 + L)

    x = jax.random.normal(keys[0], (B, T, D), dtype=jnp.float32)
    # forward() draws random (h0, c0); here made deterministic via PRNGKey(0).
    h0 = jax.random.normal(keys[1], (B, H), dtype=jnp.float32)
    c0 = jax.random.normal(keys[2], (B, H), dtype=jnp.float32)

    # Deterministic LSTMCell params, PyTorch-style uniform(-1/sqrt(H), 1/sqrt(H)).
    bound = 1.0 / (H ** 0.5)
    params = []
    for l in range(L):
        in_l = D if l == 0 else H
        kk = jax.random.split(keys[4 + l], 4)
        params.append({
            "wih": jax.random.uniform(kk[0], (4 * H, in_l), jnp.float32, -bound, bound),
            "whh": jax.random.uniform(kk[1], (4 * H, H), jnp.float32, -bound, bound),
            "bih": jax.random.uniform(kk[2], (4 * H,), jnp.float32, -bound, bound),
            "bhh": jax.random.uniform(kk[3], (4 * H,), jnp.float32, -bound, bound),
        })
    # NOTE: the module's __init__ also creates nn.Linear(H, OUT_DIM), but
    # forward() applies layers[-1] (the ReLU) to the last hidden state, so the
    # Linear never participates in the forward pass; it is intentionally unused.
    _unused_linear_w = jax.random.uniform(keys[3], (OUT_DIM, H), jnp.float32, -bound, bound)

    prepared = prepare_params(params)          # one-time, outside jit
    fwd = jax.jit(lstm_model2_forward)
    out = jax.block_until_ready(fwd(x, h0, c0, prepared))

    ref = jax.block_until_ready(lstm_model2_reference(x, h0, c0, params))
    assert out.shape == (B, H), out.shape
    assert jnp.allclose(out, ref, rtol=1e-3, atol=1e-3), "mismatch vs reference"

    print("KERNEL_OK")
</pallas_src>

<mosaic_0001>
module attributes {stable_mosaic.version = 11 : i64} {
  func.func @kernel(%arg0: memref<2x8x16xf32, #tpu.memory_space<vmem>>, %arg1: memref<2x32xf32, #tpu.memory_space<vmem>>, %arg2: memref<2x32xf32, #tpu.memory_space<vmem>>, %arg3: memref<1x128xf32, #tpu.memory_space<vmem>>, %arg4: memref<1x128xf32, #tpu.memory_space<vmem>>, %arg5: memref<16x128xf32, #tpu.memory_space<vmem>>, %arg6: memref<32x128xf32, #tpu.memory_space<vmem>>, %arg7: memref<1x128xf32, #tpu.memory_space<vmem>>, %arg8: memref<32x128xf32, #tpu.memory_space<vmem>>, %arg9: memref<32x128xf32, #tpu.memory_space<vmem>>, %arg10: memref<1x128xf32, #tpu.memory_space<vmem>>, %arg11: memref<2x32xf32, #tpu.memory_space<vmem>>) attributes {dimension_semantics = [], scalar_prefetch = 0 : i64, scratch_operands = 0 : i64, tpu.core_type = #tpu.core_type<tc>} {
    %c0 = arith.constant 0 : index
    %c0_0 = arith.constant 0 : index
    %0 = vector.load %arg5[%c0, %c0_0] : memref<16x128xf32, #tpu.memory_space<vmem>>, vector<16x128xf32>
    %c0_1 = arith.constant 0 : index
    %c0_2 = arith.constant 0 : index
    %1 = vector.load %arg8[%c0_1, %c0_2] : memref<32x128xf32, #tpu.memory_space<vmem>>, vector<32x128xf32>
    %c0_3 = arith.constant 0 : index
    %c0_4 = arith.constant 0 : index
    %2 = vector.load %arg6[%c0_3, %c0_4] : memref<32x128xf32, #tpu.memory_space<vmem>>, vector<32x128xf32>
    %c0_5 = arith.constant 0 : index
    %c0_6 = arith.constant 0 : index
    %3 = vector.load %arg9[%c0_5, %c0_6] : memref<32x128xf32, #tpu.memory_space<vmem>>, vector<32x128xf32>
    %c0_7 = arith.constant 0 : index
    %c0_8 = arith.constant 0 : index
    %4 = vector.load %arg7[%c0_7, %c0_8] : memref<1x128xf32, #tpu.memory_space<vmem>>, vector<1x128xf32>
    %c0_9 = arith.constant 0 : index
    %c0_10 = arith.constant 0 : index
    %5 = vector.load %arg10[%c0_9, %c0_10] : memref<1x128xf32, #tpu.memory_space<vmem>>, vector<1x128xf32>
    %6 = vector.shape_cast %5 : vector<1x128xf32> to vector<1x128xf32>
    %7 = vector.broadcast %6 : vector<1x128xf32> to vector<2x128xf32>
    %c0_11 = arith.constant 0 : index
    %c0_12 = arith.constant 0 : index
    %8 = vector.load %arg3[%c0_11, %c0_12] : memref<1x128xf32, #tpu.memory_space<vmem>>, vector<1x128xf32>
    %9 = vector.shape_cast %8 : vector<1x128xf32> to vector<1x128xf32>
    %10 = vector.broadcast %9 : vector<1x128xf32> to vector<2x128xf32>
    %c0_13 = arith.constant 0 : index
    %c0_14 = arith.constant 0 : index
    %11 = vector.load %arg4[%c0_13, %c0_14] : memref<1x128xf32, #tpu.memory_space<vmem>>, vector<1x128xf32>
    %12 = vector.shape_cast %11 : vector<1x128xf32> to vector<1x128xf32>
    %13 = vector.broadcast %12 : vector<1x128xf32> to vector<2x128xf32>
    %c0_15 = arith.constant 0 : index
    %c0_16 = arith.constant 0 : index
    %c0_17 = arith.constant 0 : index
    %14 = vector.load %arg0[%c0_15, %c0_16, %c0_17] : memref<2x8x16xf32, #tpu.memory_space<vmem>>, vector<2x8x16xf32>
    %15 = vector.shape_cast %14 : vector<2x8x16xf32> to vector<16x16xf32>
    %cst = arith.constant dense<0.000000e+00> : vector<16x128xf32>
    %16 = tpu.matmul %15, %0, %cst {dimension_numbers = #tpu.dot_dimension_numbers<[1], [0], [0], [1], [0, 0, 1, 1], [], []>} : vector<16x16xf32>, vector<16x128xf32>, vector<16x128xf32> -> vector<16x128xf32>
    %17 = vector.broadcast %4 : vector<1x128xf32> to vector<16x128xf32>
    %18 = arith.addf %16, %17 : vector<16x128xf32>
    %19 = vector.extract_strided_slice %18 {offsets = [0, 0], sizes = [1, 128], strides = [1, 1]} : vector<16x128xf32> to vector<1x128xf32>
    %20 = vector.extract_strided_slice %18 {offsets = [8, 0], sizes = [1, 128], strides = [1, 1]} : vector<16x128xf32> to vector<1x128xf32>
    %21 = tpu.concatenate %19, %20 in 0 : vector<1x128xf32>, vector<1x128xf32> -> vector<2x128xf32>
    %22 = vector.extract_strided_slice %18 {offsets = [1, 0], sizes = [1, 128], strides = [1, 1]} : vector<16x128xf32> to vector<1x128xf32>
    %23 = vector.extract_strided_slice %18 {offsets = [9, 0], sizes = [1, 128], strides = [1, 1]} : vector<16x128xf32> to vector<1x128xf32>
    %24 = tpu.concatenate %22, %23 in 0 : vector<1x128xf32>, vector<1x128xf32> -> vector<2x128xf32>
    %25 = vector.extract_strided_slice %18 {offsets = [2, 0], sizes = [1, 128], strides = [1, 1]} : vector<16x128xf32> to vector<1x128xf32>
    %26 = vector.extract_strided_slice %18 {offsets = [10, 0], sizes = [1, 128], strides = [1, 1]} : vector<16x128xf32> to vector<1x128xf32>
    %27 = tpu.concatenate %25, %26 in 0 : vector<1x128xf32>, vector<1x128xf32> -> vector<2x128xf32>
    %28 = vector.extract_strided_slice %18 {offsets = [3, 0], sizes = [1, 128], strides = [1, 1]} : vector<16x128xf32> to vector<1x128xf32>
    %29 = vector.extract_strided_slice %18 {offsets = [11, 0], sizes = [1, 128], strides = [1, 1]} : vector<16x128xf32> to vector<1x128xf32>
    %30 = tpu.concatenate %28, %29 in 0 : vector<1x128xf32>, vector<1x128xf32> -> vector<2x128xf32>
    %31 = vector.extract_strided_slice %18 {offsets = [4, 0], sizes = [1, 128], strides = [1, 1]} : vector<16x128xf32> to vector<1x128xf32>
    %32 = vector.extract_strided_slice %18 {offsets = [12, 0], sizes = [1, 128], strides = [1, 1]} : vector<16x128xf32> to vector<1x128xf32>
    %33 = tpu.concatenate %31, %32 in 0 : vector<1x128xf32>, vector<1x128xf32> -> vector<2x128xf32>
    %34 = vector.extract_strided_slice %18 {offsets = [5, 0], sizes = [1, 128], strides = [1, 1]} : vector<16x128xf32> to vector<1x128xf32>
    %35 = vector.extract_strided_slice %18 {offsets = [13, 0], sizes = [1, 128], strides = [1, 1]} : vector<16x128xf32> to vector<1x128xf32>
    %36 = tpu.concatenate %34, %35 in 0 : vector<1x128xf32>, vector<1x128xf32> -> vector<2x128xf32>
    %37 = vector.extract_strided_slice %18 {offsets = [6, 0], sizes = [1, 128], strides = [1, 1]} : vector<16x128xf32> to vector<1x128xf32>
    %38 = vector.extract_strided_slice %18 {offsets = [14, 0], sizes = [1, 128], strides = [1, 1]} : vector<16x128xf32> to vector<1x128xf32>
    %39 = tpu.concatenate %37, %38 in 0 : vector<1x128xf32>, vector<1x128xf32> -> vector<2x128xf32>
    %40 = vector.extract_strided_slice %18 {offsets = [7, 0], sizes = [1, 128], strides = [1, 1]} : vector<16x128xf32> to vector<1x128xf32>
    %41 = vector.extract_strided_slice %18 {offsets = [15, 0], sizes = [1, 128], strides = [1, 1]} : vector<16x128xf32> to vector<1x128xf32>
    %42 = tpu.concatenate %40, %41 in 0 : vector<1x128xf32>, vector<1x128xf32> -> vector<2x128xf32>
    %c0_18 = arith.constant 0 : index
    %c0_19 = arith.constant 0 : index
    %43 = vector.load %arg1[%c0_18, %c0_19] : memref<2x32xf32, #tpu.memory_space<vmem>>, vector<2x32xf32>
    %c0_20 = arith.constant 0 : index
    %c0_21 = arith.constant 0 : index
    %44 = vector.load %arg2[%c0_20, %c0_21] : memref<2x32xf32, #tpu.memory_space<vmem>>, vector<2x32xf32>
    %cst_22 = arith.constant dense<0.000000e+00> : vector<2x128xf32>
    %45 = tpu.matmul %43, %2, %cst_22 {dimension_numbers = #tpu.dot_dimension_numbers<[1], [0], [0], [1], [0, 0, 1, 1], [], []>} : vector<2x32xf32>, vector<32x128xf32>, vector<2x128xf32> -> vector<2x128xf32>
    %cst_23 = arith.constant dense<0.000000e+00> : vector<2x128xf32>
    %46 = tpu.matmul %43, %3, %cst_23 {dimension_numbers = #tpu.dot_dimension_numbers<[1], [0], [0], [1], [0, 0, 1, 1], [], []>} : vector<2x32xf32>, vector<32x128xf32>, vector<2x128xf32> -> vector<2x128xf32>
    %47 = arith.addf %21, %45 : vector<2x128xf32>
    %48 = math.tanh %47 : vector<2x128xf32>
    %49 = arith.mulf %48, %10 : vector<2x128xf32>
    %50 = arith.addf %49, %13 : vector<2x128xf32>
    %51 = vector.extract_strided_slice %50 {offsets = [0, 0], sizes = [2, 32], strides = [1, 1]} : vector<2x128xf32> to vector<2x32xf32>
    %52 = vector.extract_strided_slice %50 {offsets = [0, 32], sizes = [2, 32], strides = [1, 1]} : vector<2x128xf32> to vector<2x32xf32>
    %53 = vector.extract_strided_slice %50 {offsets = [0, 64], sizes = [2, 32], strides = [1, 1]} : vector<2x128xf32> to vector<2x32xf32>
    %54 = vector.extract_strided_slice %50 {offsets = [0, 96], sizes = [2, 32], strides = [1, 1]} : vector<2x128xf32> to vector<2x32xf32>
    %55 = arith.mulf %52, %44 : vector<2x32xf32>
    %56 = arith.mulf %51, %53 : vector<2x32xf32>
    %57 = arith.addf %55, %56 : vector<2x32xf32>
    %58 = math.tanh %57 : vector<2x32xf32>
    %59 = arith.mulf %54, %58 : vector<2x32xf32>
    %cst_24 = arith.constant dense<0.000000e+00> : vector<2x128xf32>
    %60 = tpu.matmul %59, %2, %cst_24 {dimension_numbers = #tpu.dot_dimension_numbers<[1], [0], [0], [1], [0, 0, 1, 1], [], []>} : vector<2x32xf32>, vector<32x128xf32>, vector<2x128xf32> -> vector<2x128xf32>
    %cst_25 = arith.constant dense<0.000000e+00> : vector<2x128xf32>
    %61 = tpu.matmul %59, %1, %cst_25 {dimension_numbers = #tpu.dot_dimension_numbers<[1], [0], [0], [1], [0, 0, 1, 1], [], []>} : vector<2x32xf32>, vector<32x128xf32>, vector<2x128xf32> -> vector<2x128xf32>
    %62 = arith.addf %61, %46 : vector<2x128xf32>
    %63 = arith.addf %62, %7 : vector<2x128xf32>
    %64 = math.tanh %63 : vector<2x128xf32>
    %65 = arith.mulf %64, %10 : vector<2x128xf32>
    %66 = arith.addf %65, %13 : vector<2x128xf32>
    %67 = vector.extract_strided_slice %66 {offsets = [0, 0], sizes = [2, 32], strides = [1, 1]} : vector<2x128xf32> to vector<2x32xf32>
    %68 = vector.extract_strided_slice %66 {offsets = [0, 32], sizes = [2, 32], strides = [1, 1]} : vector<2x128xf32> to vector<2x32xf32>
    %69 = vector.extract_strided_slice %66 {offsets = [0, 64], sizes = [2, 32], strides = [1, 1]} : vector<2x128xf32> to vector<2x32xf32>
    %70 = vector.extract_strided_slice %66 {offsets = [0, 96], sizes = [2, 32], strides = [1, 1]} : vector<2x128xf32> to vector<2x32xf32>
    %71 = arith.mulf %68, %44 : vector<2x32xf32>
    %72 = arith.mulf %67, %69 : vector<2x32xf32>
    %73 = arith.addf %71, %72 : vector<2x32xf32>
    %74 = math.tanh %73 : vector<2x32xf32>
    %75 = arith.mulf %70, %74 : vector<2x32xf32>
    %cst_26 = arith.constant dense<0.000000e+00> : vector<2x128xf32>
    %76 = tpu.matmul %75, %3, %cst_26 {dimension_numbers = #tpu.dot_dimension_numbers<[1], [0], [0], [1], [0, 0, 1, 1], [], []>} : vector<2x32xf32>, vector<32x128xf32>, vector<2x128xf32> -> vector<2x128xf32>
    %77 = arith.addf %24, %60 : vector<2x128xf32>
    %78 = math.tanh %77 : vector<2x128xf32>
    %79 = arith.mulf %78, %10 : vector<2x128xf32>
    %80 = arith.addf %79, %13 : vector<2x128xf32>
    %81 = vector.extract_strided_slice %80 {offsets = [0, 0], sizes = [2, 32], strides = [1, 1]} : vector<2x128xf32> to vector<2x32xf32>
    %82 = vector.extract_strided_slice %80 {offsets = [0, 32], sizes = [2, 32], strides = [1, 1]} : vector<2x128xf32> to vector<2x32xf32>
    %83 = vector.extract_strided_slice %80 {offsets = [0, 64], sizes = [2, 32], strides = [1, 1]} : vector<2x128xf32> to vector<2x32xf32>
    %84 = vector.extract_strided_slice %80 {offsets = [0, 96], sizes = [2, 32], strides = [1, 1]} : vector<2x128xf32> to vector<2x32xf32>
    %85 = arith.mulf %82, %57 : vector<2x32xf32>
    %86 = arith.mulf %81, %83 : vector<2x32xf32>
    %87 = arith.addf %85, %86 : vector<2x32xf32>
    %88 = math.tanh %87 : vector<2x32xf32>
    %89 = arith.mulf %84, %88 : vector<2x32xf32>
    %cst_27 = arith.constant dense<0.000000e+00> : vector<2x128xf32>
    %90 = tpu.matmul %89, %2, %cst_27 {dimension_numbers = #tpu.dot_dimension_numbers<[1], [0], [0], [1], [0, 0, 1, 1], [], []>} : vector<2x32xf32>, vector<32x128xf32>, vector<2x128xf32> -> vector<2x128xf32>
    %cst_28 = arith.constant dense<0.000000e+00> : vector<2x128xf32>
    %91 = tpu.matmul %89, %1, %cst_28 {dimension_numbers = #tpu.dot_dimension_numbers<[1], [0], [0], [1], [0, 0, 1, 1], [], []>} : vector<2x32xf32>, vector<32x128xf32>, vector<2x128xf32> -> vector<2x128xf32>
    %92 = arith.addf %91, %76 : vector<2x128xf32>
    %93 = arith.addf %92, %7 : vector<2x128xf32>
    %94 = math.tanh %93 : vector<2x128xf32>
    %95 = arith.mulf %94, %10 : vector<2x128xf32>
    %96 = arith.addf %95, %13 : vector<2x128xf32>
    %97 = vector.extract_strided_slice %96 {offsets = [0, 0], sizes = [2, 32], strides = [1, 1]} : vector<2x128xf32> to vector<2x32xf32>
    %98 = vector.extract_strided_slice %96 {offsets = [0, 32], sizes = [2, 32], strides = [1, 1]} : vector<2x128xf32> to vector<2x32xf32>
    %99 = vector.extract_strided_slice %96 {offsets = [0, 64], sizes = [2, 32], strides = [1, 1]} : vector<2x128xf32> to vector<2x32xf32>
    %100 = vector.extract_strided_slice %96 {offsets = [0, 96], sizes = [2, 32], strides = [1, 1]} : vector<2x128xf32> to vector<2x32xf32>
    %101 = arith.mulf %98, %73 : vector<2x32xf32>
    %102 = arith.mulf %97, %99 : vector<2x32xf32>
    %103 = arith.addf %101, %102 : vector<2x32xf32>
    %104 = math.tanh %103 : vector<2x32xf32>
    %105 = arith.mulf %100, %104 : vector<2x32xf32>
    %cst_29 = arith.constant dense<0.000000e+00> : vector<2x128xf32>
    %106 = tpu.matmul %105, %3, %cst_29 {dimension_numbers = #tpu.dot_dimension_numbers<[1], [0], [0], [1], [0, 0, 1, 1], [], []>} : vector<2x32xf32>, vector<32x128xf32>, vector<2x128xf32> -> vector<2x128xf32>
    %107 = arith.addf %27, %90 : vector<2x128xf32>
    %108 = math.tanh %107 : vector<2x128xf32>
    %109 = arith.mulf %108, %10 : vector<2x128xf32>
    %110 = arith.addf %109, %13 : vector<2x128xf32>
    %111 = vector.extract_strided_slice %110 {offsets = [0, 0], sizes = [2, 32], strides = [1, 1]} : vector<2x128xf32> to vector<2x32xf32>
    %112 = vector.extract_strided_slice %110 {offsets = [0, 32], sizes = [2, 32], strides = [1, 1]} : vector<2x128xf32> to vector<2x32xf32>
    %113 = vector.extract_strided_slice %110 {offsets = [0, 64], sizes = [2, 32], strides = [1, 1]} : vector<2x128xf32> to vector<2x32xf32>
    %114 = vector.extract_strided_slice %110 {offsets = [0, 96], sizes = [2, 32], strides = [1, 1]} : vector<2x128xf32> to vector<2x32xf32>
    %115 = arith.mulf %112, %87 : vector<2x32xf32>
    %116 = arith.mulf %111, %113 : vector<2x32xf32>
    %117 = arith.addf %115, %116 : vector<2x32xf32>
    %118 = math.tanh %117 : vector<2x32xf32>
    %119 = arith.mulf %114, %118 : vector<2x32xf32>
    %cst_30 = arith.constant dense<0.000000e+00> : vector<2x128xf32>
    %120 = tpu.matmul %119, %2, %cst_30 {dimension_numbers = #tpu.dot_dimension_numbers<[1], [0], [0], [1], [0, 0, 1, 1], [], []>} : vector<2x32xf32>, vector<32x128xf32>, vector<2x128xf32> -> vector<2x128xf32>
    %cst_31 = arith.constant dense<0.000000e+00> : vector<2x128xf32>
    %121 = tpu.matmul %119, %1, %cst_31 {dimension_numbers = #tpu.dot_dimension_numbers<[1], [0], [0], [1], [0, 0, 1, 1], [], []>} : vector<2x32xf32>, vector<32x128xf32>, vector<2x128xf32> -> vector<2x128xf32>
    %122 = arith.addf %121, %106 : vector<2x128xf32>
    %123 = arith.addf %122, %7 : vector<2x128xf32>
    %124 = math.tanh %123 : vector<2x128xf32>
    %125 = arith.mulf %124, %10 : vector<2x128xf32>
    %126 = arith.addf %125, %13 : vector<2x128xf32>
    %127 = vector.extract_strided_slice %126 {offsets = [0, 0], sizes = [2, 32], strides = [1, 1]} : vector<2x128xf32> to vector<2x32xf32>
    %128 = vector.extract_strided_slice %126 {offsets = [0, 32], sizes = [2, 32], strides = [1, 1]} : vector<2x128xf32> to vector<2x32xf32>
    %129 = vector.extract_strided_slice %126 {offsets = [0, 64], sizes = [2, 32], strides = [1, 1]} : vector<2x128xf32> to vector<2x32xf32>
    %130 = vector.extract_strided_slice %126 {offsets = [0, 96], sizes = [2, 32], strides = [1, 1]} : vector<2x128xf32> to vector<2x32xf32>
    %131 = arith.mulf %128, %103 : vector<2x32xf32>
    %132 = arith.mulf %127, %129 : vector<2x32xf32>
    %133 = arith.addf %131, %132 : vector<2x32xf32>
    %134 = math.tanh %133 : vector<2x32xf32>
    %135 = arith.mulf %130, %134 : vector<2x32xf32>
    %cst_32 = arith.constant dense<0.000000e+00> : vector<2x128xf32>
    %136 = tpu.matmul %135, %3, %cst_32 {dimension_numbers = #tpu.dot_dimension_numbers<[1], [0], [0], [1], [0, 0, 1, 1], [], []>} : vector<2x32xf32>, vector<32x128xf32>, vector<2x128xf32> -> vector<2x128xf32>
    %137 = arith.addf %30, %120 : vector<2x128xf32>
    %138 = math.tanh %137 : vector<2x128xf32>
    %139 = arith.mulf %138, %10 : vector<2x128xf32>
    %140 = arith.addf %139, %13 : vector<2x128xf32>
    %141 = vector.extract_strided_slice %140 {offsets = [0, 0], sizes = [2, 32], strides = [1, 1]} : vector<2x128xf32> to vector<2x32xf32>
    %142 = vector.extract_strided_slice %140 {offsets = [0, 32], sizes = [2, 32], strides = [1, 1]} : vector<2x128xf32> to vector<2x32xf32>
    %143 = vector.extract_strided_slice %140 {offsets = [0, 64], sizes = [2, 32], strides = [1, 1]} : vector<2x128xf32> to vector<2x32xf32>
    %144 = vector.extract_strided_slice %140 {offsets = [0, 96], sizes = [2, 32], strides = [1, 1]} : vector<2x128xf32> to vector<2x32xf32>
    %145 = arith.mulf %142, %117 : vector<2x32xf32>
    %146 = arith.mulf %141, %143 : vector<2x32xf32>
    %147 = arith.addf %145, %146 : vector<2x32xf32>
    %148 = math.tanh %147 : vector<2x32xf32>
    %149 = arith.mulf %144, %148 : vector<2x32xf32>
    %cst_33 = arith.constant dense<0.000000e+00> : vector<2x128xf32>
    %150 = tpu.matmul %149, %2, %cst_33 {dimension_numbers = #tpu.dot_dimension_numbers<[1], [0], [0], [1], [0, 0, 1, 1], [], []>} : vector<2x32xf32>, vector<32x128xf32>, vector<2x128xf32> -> vector<2x128xf32>
    %cst_34 = arith.constant dense<0.000000e+00> : vector<2x128xf32>
    %151 = tpu.matmul %149, %1, %cst_34 {dimension_numbers = #tpu.dot_dimension_numbers<[1], [0], [0], [1], [0, 0, 1, 1], [], []>} : vector<2x32xf32>, vector<32x128xf32>, vector<2x128xf32> -> vector<2x128xf32>
    %152 = arith.addf %151, %136 : vector<2x128xf32>
    %153 = arith.addf %152, %7 : vector<2x128xf32>
    %154 = math.tanh %153 : vector<2x128xf32>
    %155 = arith.mulf %154, %10 : vector<2x128xf32>
    %156 = arith.addf %155, %13 : vector<2x128xf32>
    %157 = vector.extract_strided_slice %156 {offsets = [0, 0], sizes = [2, 32], strides = [1, 1]} : vector<2x128xf32> to vector<2x32xf32>
    %158 = vector.extract_strided_slice %156 {offsets = [0, 32], sizes = [2, 32], strides = [1, 1]} : vector<2x128xf32> to vector<2x32xf32>
    %159 = vector.extract_strided_slice %156 {offsets = [0, 64], sizes = [2, 32], strides = [1, 1]} : vector<2x128xf32> to vector<2x32xf32>
    %160 = vector.extract_strided_slice %156 {offsets = [0, 96], sizes = [2, 32], strides = [1, 1]} : vector<2x128xf32> to vector<2x32xf32>
    %161 = arith.mulf %158, %133 : vector<2x32xf32>
    %162 = arith.mulf %157, %159 : vector<2x32xf32>
    %163 = arith.addf %161, %162 : vector<2x32xf32>
    %164 = math.tanh %163 : vector<2x32xf32>
    %165 = arith.mulf %160, %164 : vector<2x32xf32>
    %cst_35 = arith.constant dense<0.000000e+00> : vector<2x128xf32>
    %166 = tpu.matmul %165, %3, %cst_35 {dimension_numbers = #tpu.dot_dimension_numbers<[1], [0], [0], [1], [0, 0, 1, 1], [], []>} : vector<2x32xf32>, vector<32x128xf32>, vector<2x128xf32> -> vector<2x128xf32>
    %167 = arith.addf %33, %150 : vector<2x128xf32>
    %168 = math.tanh %167 : vector<2x128xf32>
    %169 = arith.mulf %168, %10 : vector<2x128xf32>
    %170 = arith.addf %169, %13 : vector<2x128xf32>
    %171 = vector.extract_strided_slice %170 {offsets = [0, 0], sizes = [2, 32], strides = [1, 1]} : vector<2x128xf32> to vector<2x32xf32>
    %172 = vector.extract_strided_slice %170 {offsets = [0, 32], sizes = [2, 32], strides = [1, 1]} : vector<2x128xf32> to vector<2x32xf32>
    %173 = vector.extract_strided_slice %170 {offsets = [0, 64], sizes = [2, 32], strides = [1, 1]} : vector<2x128xf32> to vector<2x32xf32>
    %174 = vector.extract_strided_slice %170 {offsets = [0, 96], sizes = [2, 32], strides = [1, 1]} : vector<2x128xf32> to vector<2x32xf32>
    %175 = arith.mulf %172, %147 : vector<2x32xf32>
    %176 = arith.mulf %171, %173 : vector<2x32xf32>
    %177 = arith.addf %175, %176 : vector<2x32xf32>
    %178 = math.tanh %177 : vector<2x32xf32>
    %179 = arith.mulf %174, %178 : vector<2x32xf32>
    %cst_36 = arith.constant dense<0.000000e+00> : vector<2x128xf32>
    %180 = tpu.matmul %179, %2, %cst_36 {dimension_numbers = #tpu.dot_dimension_numbers<[1], [0], [0], [1], [0, 0, 1, 1], [], []>} : vector<2x32xf32>, vector<32x128xf32>, vector<2x128xf32> -> vector<2x128xf32>
    %cst_37 = arith.constant dense<0.000000e+00> : vector<2x128xf32>
    %181 = tpu.matmul %179, %1, %cst_37 {dimension_numbers = #tpu.dot_dimension_numbers<[1], [0], [0], [1], [0, 0, 1, 1], [], []>} : vector<2x32xf32>, vector<32x128xf32>, vector<2x128xf32> -> vector<2x128xf32>
    %182 = arith.addf %181, %166 : vector<2x128xf32>
    %183 = arith.addf %182, %7 : vector<2x128xf32>
    %184 = math.tanh %183 : vector<2x128xf32>
    %185 = arith.mulf %184, %10 : vector<2x128xf32>
    %186 = arith.addf %185, %13 : vector<2x128xf32>
    %187 = vector.extract_strided_slice %186 {offsets = [0, 0], sizes = [2, 32], strides = [1, 1]} : vector<2x128xf32> to vector<2x32xf32>
    %188 = vector.extract_strided_slice %186 {offsets = [0, 32], sizes = [2, 32], strides = [1, 1]} : vector<2x128xf32> to vector<2x32xf32>
    %189 = vector.extract_strided_slice %186 {offsets = [0, 64], sizes = [2, 32], strides = [1, 1]} : vector<2x128xf32> to vector<2x32xf32>
    %190 = vector.extract_strided_slice %186 {offsets = [0, 96], sizes = [2, 32], strides = [1, 1]} : vector<2x128xf32> to vector<2x32xf32>
    %191 = arith.mulf %188, %163 : vector<2x32xf32>
    %192 = arith.mulf %187, %189 : vector<2x32xf32>
    %193 = arith.addf %191, %192 : vector<2x32xf32>
    %194 = math.tanh %193 : vector<2x32xf32>
    %195 = arith.mulf %190, %194 : vector<2x32xf32>
    %cst_38 = arith.constant dense<0.000000e+00> : vector<2x128xf32>
    %196 = tpu.matmul %195, %3, %cst_38 {dimension_numbers = #tpu.dot_dimension_numbers<[1], [0], [0], [1], [0, 0, 1, 1], [], []>} : vector<2x32xf32>, vector<32x128xf32>, vector<2x128xf32> -> vector<2x128xf32>
    %197 = arith.addf %36, %180 : vector<2x128xf32>
    %198 = math.tanh %197 : vector<2x128xf32>
    %199 = arith.mulf %198, %10 : vector<2x128xf32>
    %200 = arith.addf %199, %13 : vector<2x128xf32>
    %201 = vector.extract_strided_slice %200 {offsets = [0, 0], sizes = [2, 32], strides = [1, 1]} : vector<2x128xf32> to vector<2x32xf32>
    %202 = vector.extract_strided_slice %200 {offsets = [0, 32], sizes = [2, 32], strides = [1, 1]} : vector<2x128xf32> to vector<2x32xf32>
    %203 = vector.extract_strided_slice %200 {offsets = [0, 64], sizes = [2, 32], strides = [1, 1]} : vector<2x128xf32> to vector<2x32xf32>
    %204 = vector.extract_strided_slice %200 {offsets = [0, 96], sizes = [2, 32], strides = [1, 1]} : vector<2x128xf32> to vector<2x32xf32>
    %205 = arith.mulf %202, %177 : vector<2x32xf32>
    %206 = arith.mulf %201, %203 : vector<2x32xf32>
    %207 = arith.addf %205, %206 : vector<2x32xf32>
    %208 = math.tanh %207 : vector<2x32xf32>
    %209 = arith.mulf %204, %208 : vector<2x32xf32>
    %cst_39 = arith.constant dense<0.000000e+00> : vector<2x128xf32>
    %210 = tpu.matmul %209, %2, %cst_39 {dimension_numbers = #tpu.dot_dimension_numbers<[1], [0], [0], [1], [0, 0, 1, 1], [], []>} : vector<2x32xf32>, vector<32x128xf32>, vector<2x128xf32> -> vector<2x128xf32>
    %cst_40 = arith.constant dense<0.000000e+00> : vector<2x128xf32>
    %211 = tpu.matmul %209, %1, %cst_40 {dimension_numbers = #tpu.dot_dimension_numbers<[1], [0], [0], [1], [0, 0, 1, 1], [], []>} : vector<2x32xf32>, vector<32x128xf32>, vector<2x128xf32> -> vector<2x128xf32>
    %212 = arith.addf %211, %196 : vector<2x128xf32>
    %213 = arith.addf %212, %7 : vector<2x128xf32>
    %214 = math.tanh %213 : vector<2x128xf32>
    %215 = arith.mulf %214, %10 : vector<2x128xf32>
    %216 = arith.addf %215, %13 : vector<2x128xf32>
    %217 = vector.extract_strided_slice %216 {offsets = [0, 0], sizes = [2, 32], strides = [1, 1]} : vector<2x128xf32> to vector<2x32xf32>
    %218 = vector.extract_strided_slice %216 {offsets = [0, 32], sizes = [2, 32], strides = [1, 1]} : vector<2x128xf32> to vector<2x32xf32>
    %219 = vector.extract_strided_slice %216 {offsets = [0, 64], sizes = [2, 32], strides = [1, 1]} : vector<2x128xf32> to vector<2x32xf32>
    %220 = vector.extract_strided_slice %216 {offsets = [0, 96], sizes = [2, 32], strides = [1, 1]} : vector<2x128xf32> to vector<2x32xf32>
    %221 = arith.mulf %218, %193 : vector<2x32xf32>
    %222 = arith.mulf %217, %219 : vector<2x32xf32>
    %223 = arith.addf %221, %222 : vector<2x32xf32>
    %224 = math.tanh %223 : vector<2x32xf32>
    %225 = arith.mulf %220, %224 : vector<2x32xf32>
    %cst_41 = arith.constant dense<0.000000e+00> : vector<2x128xf32>
    %226 = tpu.matmul %225, %3, %cst_41 {dimension_numbers = #tpu.dot_dimension_numbers<[1], [0], [0], [1], [0, 0, 1, 1], [], []>} : vector<2x32xf32>, vector<32x128xf32>, vector<2x128xf32> -> vector<2x128xf32>
    %227 = arith.addf %39, %210 : vector<2x128xf32>
    %228 = math.tanh %227 : vector<2x128xf32>
    %229 = arith.mulf %228, %10 : vector<2x128xf32>
    %230 = arith.addf %229, %13 : vector<2x128xf32>
    %231 = vector.extract_strided_slice %230 {offsets = [0, 0], sizes = [2, 32], strides = [1, 1]} : vector<2x128xf32> to vector<2x32xf32>
    %232 = vector.extract_strided_slice %230 {offsets = [0, 32], sizes = [2, 32], strides = [1, 1]} : vector<2x128xf32> to vector<2x32xf32>
    %233 = vector.extract_strided_slice %230 {offsets = [0, 64], sizes = [2, 32], strides = [1, 1]} : vector<2x128xf32> to vector<2x32xf32>
    %234 = vector.extract_strided_slice %230 {offsets = [0, 96], sizes = [2, 32], strides = [1, 1]} : vector<2x128xf32> to vector<2x32xf32>
    %235 = arith.mulf %232, %207 : vector<2x32xf32>
    %236 = arith.mulf %231, %233 : vector<2x32xf32>
    %237 = arith.addf %235, %236 : vector<2x32xf32>
    %238 = math.tanh %237 : vector<2x32xf32>
    %239 = arith.mulf %234, %238 : vector<2x32xf32>
    %cst_42 = arith.constant dense<0.000000e+00> : vector<2x128xf32>
    %240 = tpu.matmul %239, %2, %cst_42 {dimension_numbers = #tpu.dot_dimension_numbers<[1], [0], [0], [1], [0, 0, 1, 1], [], []>} : vector<2x32xf32>, vector<32x128xf32>, vector<2x128xf32> -> vector<2x128xf32>
    %cst_43 = arith.constant dense<0.000000e+00> : vector<2x128xf32>
    %241 = tpu.matmul %239, %1, %cst_43 {dimension_numbers = #tpu.dot_dimension_numbers<[1], [0], [0], [1], [0, 0, 1, 1], [], []>} : vector<2x32xf32>, vector<32x128xf32>, vector<2x128xf32> -> vector<2x128xf32>
    %242 = arith.addf %241, %226 : vector<2x128xf32>
    %243 = arith.addf %242, %7 : vector<2x128xf32>
    %244 = math.tanh %243 : vector<2x128xf32>
    %245 = arith.mulf %244, %10 : vector<2x128xf32>
    %246 = arith.addf %245, %13 : vector<2x128xf32>
    %247 = vector.extract_strided_slice %246 {offsets = [0, 0], sizes = [2, 32], strides = [1, 1]} : vector<2x128xf32> to vector<2x32xf32>
    %248 = vector.extract_strided_slice %246 {offsets = [0, 32], sizes = [2, 32], strides = [1, 1]} : vector<2x128xf32> to vector<2x32xf32>
    %249 = vector.extract_strided_slice %246 {offsets = [0, 64], sizes = [2, 32], strides = [1, 1]} : vector<2x128xf32> to vector<2x32xf32>
    %250 = vector.extract_strided_slice %246 {offsets = [0, 96], sizes = [2, 32], strides = [1, 1]} : vector<2x128xf32> to vector<2x32xf32>
    %251 = arith.mulf %248, %223 : vector<2x32xf32>
    %252 = arith.mulf %247, %249 : vector<2x32xf32>
    %253 = arith.addf %251, %252 : vector<2x32xf32>
    %254 = math.tanh %253 : vector<2x32xf32>
    %255 = arith.mulf %250, %254 : vector<2x32xf32>
    %cst_44 = arith.constant dense<0.000000e+00> : vector<2x128xf32>
    %256 = tpu.matmul %255, %3, %cst_44 {dimension_numbers = #tpu.dot_dimension_numbers<[1], [0], [0], [1], [0, 0, 1, 1], [], []>} : vector<2x32xf32>, vector<32x128xf32>, vector<2x128xf32> -> vector<2x128xf32>
    %257 = arith.addf %42, %240 : vector<2x128xf32>
    %258 = math.tanh %257 : vector<2x128xf32>
    %259 = arith.mulf %258, %10 : vector<2x128xf32>
    %260 = arith.addf %259, %13 : vector<2x128xf32>
    %261 = vector.extract_strided_slice %260 {offsets = [0, 0], sizes = [2, 32], strides = [1, 1]} : vector<2x128xf32> to vector<2x32xf32>
    %262 = vector.extract_strided_slice %260 {offsets = [0, 32], sizes = [2, 32], strides = [1, 1]} : vector<2x128xf32> to vector<2x32xf32>
    %263 = vector.extract_strided_slice %260 {offsets = [0, 64], sizes = [2, 32], strides = [1, 1]} : vector<2x128xf32> to vector<2x32xf32>
    %264 = vector.extract_strided_slice %260 {offsets = [0, 96], sizes = [2, 32], strides = [1, 1]} : vector<2x128xf32> to vector<2x32xf32>
    %265 = arith.mulf %262, %237 : vector<2x32xf32>
    %266 = arith.mulf %261, %263 : vector<2x32xf32>
    %267 = arith.addf %265, %266 : vector<2x32xf32>
    %268 = math.tanh %267 : vector<2x32xf32>
    %269 = arith.mulf %264, %268 : vector<2x32xf32>
    %cst_45 = arith.constant dense<0.000000e+00> : vector<2x128xf32>
    %270 = tpu.matmul %269, %1, %cst_45 {dimension_numbers = #tpu.dot_dimension_numbers<[1], [0], [0], [1], [0, 0, 1, 1], [], []>} : vector<2x32xf32>, vector<32x128xf32>, vector<2x128xf32> -> vector<2x128xf32>
    %271 = arith.addf %270, %256 : vector<2x128xf32>
    %272 = arith.addf %271, %7 : vector<2x128xf32>
    %273 = math.tanh %272 : vector<2x128xf32>
    %274 = arith.mulf %273, %10 : vector<2x128xf32>
    %275 = arith.addf %274, %13 : vector<2x128xf32>
    %276 = vector.extract_strided_slice %275 {offsets = [0, 0], sizes = [2, 32], strides = [1, 1]} : vector<2x128xf32> to vector<2x32xf32>
    %277 = vector.extract_strided_slice %275 {offsets = [0, 32], sizes = [2, 32], strides = [1, 1]} : vector<2x128xf32> to vector<2x32xf32>
    %278 = vector.extract_strided_slice %275 {offsets = [0, 64], sizes = [2, 32], strides = [1, 1]} : vector<2x128xf32> to vector<2x32xf32>
    %279 = vector.extract_strided_slice %275 {offsets = [0, 96], sizes = [2, 32], strides = [1, 1]} : vector<2x128xf32> to vector<2x32xf32>
    %280 = arith.mulf %277, %253 : vector<2x32xf32>
    %281 = arith.mulf %276, %278 : vector<2x32xf32>
    %282 = arith.addf %280, %281 : vector<2x32xf32>
    %283 = math.tanh %282 : vector<2x32xf32>
    %284 = arith.mulf %279, %283 : vector<2x32xf32>
    %cst_46 = arith.constant 0.000000e+00 : f32
    %285 = vector.broadcast %cst_46 : f32 to vector<2x32xf32>
    %286 = arith.maximumf %284, %285 : vector<2x32xf32>
    %c0_47 = arith.constant 0 : index
    %c0_48 = arith.constant 0 : index
    %287 = vector.load %arg11[%c0_47, %c0_48] : memref<2x32xf32, #tpu.memory_space<vmem>>, vector<2x32xf32>
    tpu.vector_store %arg11[%c0_47, %c0_48], %286 {strides = array<i32>} : memref<2x32xf32, #tpu.memory_space<vmem>>, vector<2x32xf32>,
    return
  }
}

</mosaic_0001>

<bundles_post_ra>
// kernel: lstm_model2_forward.1
= control target key start
LH: loop header
LB: loop body
LE: loop exit
PB: predicated region body
PF: predicated region fallthrough
CT: control target
= control target key end

     0   :  { %16 = vsyncpa [#allocation3], 0  ;;  %s3864_s0 = inlined_call_operand.hbm [shape: f32[2,8,16], index: 0, kind: input, shape index: {}]   ;;  %s3865_s1 = inlined_call_operand.vmem [shape: f32[2,32], index: 1, kind: input, shape index: {}]   ;;  %s3866_s2 = inlined_call_operand.hbm [shape: f32[2,32], index: 2, kind: input, shape index: {}]   ;;  %s3867_s3 = inlined_call_operand.hbm [shape: f32[1,128], index: 3, kind: input, shape index: {}]   ;;  %s3868_s4 = inlined_call_operand.hbm [shape: f32[1,128], index: 4, kind: input, shape index: {}]   ;;  %s3869_s5 = inlined_call_operand.hbm [shape: f32[16,128], index: 5, kind: input, shape index: {}]   ;;  %s3870_s6 = inlined_call_operand.hbm [shape: f32[32,128], index: 6, kind: input, shape index: {}]   ;;  %s3871_s7 = inlined_call_operand.hbm [shape: f32[1,128], index: 7, kind: input, shape index: {}]   ;;  %s3872_s8 = inlined_call_operand.hbm [shape: f32[32,128], index: 8, kind: input, shape index: {}]   ;;  %s3873_s9 = inlined_call_operand.vmem [shape: f32[32,128], index: 9, kind: input, shape index: {}]   ;;  %s3874_s10 = inlined_call_operand.vmem [shape: f32[1,128], index: 10, kind: input, shape index: {}]   ;;  %s3875_s11 = inlined_call_operand.hbm [shape: f32[2,32], index: 11, kind: output, shape index: {}]  }
   0x1   :  { %17 = vsyncpa [#allocation6], 0 }
   0x2   :  { %18 = vsyncpa [#allocation9], 0 }
   0x3   :  { %19 = vsyncpa [#allocation12], 0 }
   0x4   :  { %20 = vsyncpa [#allocation15], 0 }
   0x5   :  { %21 = vsyncpa [#allocation4], 0  ;;  %s3295_s17 = smov [#allocation5]   ;;  %s3296_s19 = smov [#allocation8]  }
   0x6   :  { %s42_s18 = sshll.u32 %s3295_s17, 4  ;;  %s62_s20 = sshll.u32 %s3296_s19, 4  ;;  %s43_s18 = int_to_ptr.vmem [resolvable:$true] %s42_s18  ;;  %s63_s20 = int_to_ptr.vmem [resolvable:$true] %s62_s20 }
   0x7   :  { %s3085_s23 = scalar_lea.hbm %s3866_s2, 32 }
   0x8   :  { %p3086_p0 = scmp.ne.s32.totalorder %s3866_s2, %s3085_s23  ;;  %p3089_p1 = scmp.lt.u32.totalorder %s3085_s23, %s3866_s2 }
   0xa   :  { %p3091_p2 = pnand %p3089_p1, %p3086_p0 }
   0xc   :  { %3094 = shalt.err (!%p3091_p2)
}
   0xd   :  { %s3095_s28 = scalar_lea.vmem %s43_s18, 32  ;;  %p3100_p4 = scmp.lt.s32.totalorder %s43_s18, %s43_s18 }
   0xe   :  { %p3096_p3 = scmp.ne.s32.totalorder %s43_s18, %s3095_s28  ;;  %p3101_p5 = scmp.lt.s32.totalorder %s3095_s28, %s3095_s28 }
  0x10   :  { %p3102_p6 = por %p3101_p5, %p3100_p4 }
  0x12   :  { %p3103_p7 = pnand %p3102_p6, %p3096_p3 }
  0x14   :  { %3106 = shalt.err (!%p3103_p7)
}
  0x15   :  { %45 = dma.hbm_to_vmem [thread:$0]  %s3866_s2, 32, %s43_s18, [#allocation6]  }
  0x16   :  { %s3107_s14 = scalar_lea.hbm %s3868_s4, 16 }
  0x17   :  { %p3108_p8 = scmp.ne.s32.totalorder %s3868_s4, %s3107_s14  ;;  %p3111_p9 = scmp.lt.u32.totalorder %s3107_s14, %s3868_s4 }
  0x19   :  { %p3113_p10 = pnand %p3111_p9, %p3108_p8 }
  0x1b   :  { %3116 = shalt.err (!%p3113_p10)
}
  0x1c   :  { %s3117_s21 = scalar_lea.vmem %s63_s20, 16  ;;  %s3121_s22 = scalar_lea.vmem %s63_s20, 32 }
  0x1d   :  { %p3118_p11 = scmp.ne.s32.totalorder %s63_s20, %s3117_s21  ;;  %p3122_p12 = scmp.lt.s32.totalorder %s63_s20, %s63_s20 }
  0x1e   :  { %p3123_p13 = scmp.lt.s32.totalorder %s3121_s22, %s3117_s21 }
  0x20   :  { %p3124_p0 = por %p3123_p13, %p3122_p12 }
  0x22   :  { %p3125_p1 = pnand %p3124_p0, %p3118_p11 }
  0x24   :  { %3128 = shalt.err (!%p3125_p1)
}
  0x25   :  { %65 = dma.hbm_to_vmem [thread:$0]  %s3868_s4, 16, %s63_s20, [#allocation9]  }
  0x26   :  { %s3297_s23 = smov [#allocation11]   ;;  %s3298_s25 = smov [#allocation2]  }
  0x27   :  { %s83_s24 = sshll.u32 %s3297_s23, 4  ;;  %s27_s26 = sshll.u32 %s3298_s25, 4  ;;  %s84_s24 = int_to_ptr.vmem [resolvable:$true] %s83_s24  ;;  %s3395_s26 = int_to_ptr.vmem [resolvable:$true] %s27_s26 }
  0x28   :  { %s3129_s29 = scalar_lea.hbm %s3870_s6, 512 }
  0x29   :  { %p3130_p2 = scmp.ne.s32.totalorder %s3870_s6, %s3129_s29  ;;  %p3133_p3 = scmp.lt.u32.totalorder %s3129_s29, %s3870_s6 }
  0x2b   :  { %p3135_p4 = pnand %p3133_p3, %p3130_p2 }
  0x2d   :  { %3138 = shalt.err (!%p3135_p4)
}
  0x2e   :  { %s3139_s4 = scalar_lea.vmem %s84_s24, 512  ;;  %p3144_p6 = scmp.lt.s32.totalorder %s84_s24, %s84_s24 }
  0x2f   :  { %p3140_p5 = scmp.ne.s32.totalorder %s84_s24, %s3139_s4  ;;  %p3145_p7 = scmp.lt.s32.totalorder %s3139_s4, %s3139_s4 }
  0x31   :  { %p3146_p8 = por %p3145_p7, %p3144_p6 }
  0x33   :  { %p3147_p9 = pnand %p3146_p8, %p3140_p5 }
  0x35   :  { %3150 = shalt.err (!%p3147_p9)
}
  0x36   :  { %s3299_s20 = smov 128   ;;  %s3300_s15 = smov 8  }
  0x37   :  { %89 = dma.hbm_to_vmem [thread:$0]  %s3870_s6, 512, %s84_s24, [#allocation12], %s3299_s20, %s3299_s20, %s3300_s15  }
  0x38   :  { %s3151_s22 = scalar_lea.hbm %s3864_s0, 256 }
  0x39   :  { %p3152_p10 = scmp.ne.s32.totalorder %s3864_s0, %s3151_s22  ;;  %p3155_p11 = scmp.lt.u32.totalorder %s3151_s22, %s3864_s0 }
  0x3b   :  { %p3157_p12 = pnand %p3155_p11, %p3152_p10 }
  0x3d   :  { %3160 = shalt.err (!%p3157_p12)
}
  0x3e   :  { %s3161_s27 = scalar_lea.vmem %s3395_s26, 256  ;;  %p3166_p0 = scmp.lt.s32.totalorder %s3395_s26, %s3395_s26 }
  0x3f   :  { %p3162_p13 = scmp.ne.s32.totalorder %s3395_s26, %s3161_s27  ;;  %p3167_p1 = scmp.lt.s32.totalorder %s3161_s27, %s3161_s27 }
  0x41   :  { %p3168_p2 = por %p3167_p1, %p3166_p0 }
  0x43   :  { %p3169_p3 = pnand %p3168_p2, %p3162_p13 }
  0x45   :  { %3172 = shalt.err (!%p3169_p3)
}
  0x46   :  { %33 = dma.hbm_to_vmem [thread:$0]  %s3864_s0, 256, %s3395_s26, [#allocation3], %s3299_s20, %s3299_s20, %s3300_s15  }
  0x47   :  { %s3301_s28 = smov [#allocation7]   ;;  %s3302_s30 = smov [#allocation10]  }
  0x48   :  { %s52_s29 = sshll.u32 %s3301_s28, 4  ;;  %s71_s12 = sshll.u32 %s3302_s30, 4  ;;  %s53_s29 = int_to_ptr.vmem [resolvable:$true] %s52_s29  ;;  %s3432_s12 = int_to_ptr.vmem [resolvable:$true] %s71_s12 }
  0x49   :  { %s3173_s4 = scalar_lea.hbm %s3867_s3, 16 }
  0x4a   :  { %p3174_p4 = scmp.ne.s32.totalorder %s3867_s3, %s3173_s4  ;;  %p3177_p5 = scmp.lt.u32.totalorder %s3173_s4, %s3867_s3 }
  0x4c   :  { %p3179_p6 = pnand %p3177_p5, %p3174_p4 }
  0x4e   :  { %3182 = shalt.err (!%p3179_p6)
}
  0x4f   :  { %s3183_s0 = scalar_lea.vmem %s53_s29, 16  ;;  %s3187_s26 = scalar_lea.vmem %s53_s29, 32 }
  0x50   :  { %p3184_p7 = scmp.ne.s32.totalorder %s53_s29, %s3183_s0  ;;  %p3188_p8 = scmp.lt.s32.totalorder %s53_s29, %s53_s29 }
  0x51   :  { %p3189_p9 = scmp.lt.s32.totalorder %s3187_s26, %s3183_s0 }
  0x53   :  { %p3190_p10 = por %p3189_p9, %p3188_p8 }
  0x55   :  { %p3191_p11 = pnand %p3190_p10, %p3184_p7 }
  0x57   :  { %3194 = shalt.err (!%p3191_p11)
}
  0x58   :  { %55 = dma.hbm_to_vmem [thread:$0]  %s3867_s3, 16, %s53_s29, [#allocation6]  }
  0x59   :  { %s3195_s25 = scalar_lea.hbm %s3869_s5, 256 }
  0x5a   :  { %p3196_p12 = scmp.ne.s32.totalorder %s3869_s5, %s3195_s25  ;;  %p3199_p13 = scmp.lt.u32.totalorder %s3195_s25, %s3869_s5 }
  0x5c   :  { %p3201_p0 = pnand %p3199_p13, %p3196_p12 }
  0x5e   :  { %3204 = shalt.err (!%p3201_p0)
}
  0x5f   :  { %s3205_s30 = scalar_lea.vmem %s3432_s12, 256  ;;  %p3210_p2 = scmp.lt.s32.totalorder %s3432_s12, %s3432_s12 }
  0x60   :  { %p3206_p1 = scmp.ne.s32.totalorder %s3432_s12, %s3205_s30  ;;  %p3211_p3 = scmp.lt.s32.totalorder %s3205_s30, %s3205_s30 }
  0x62   :  { %p3212_p4 = por %p3211_p3, %p3210_p2 }
  0x64   :  { %p3213_p5 = pnand %p3212_p4, %p3206_p1 }
  0x66   :  { %3216 = shalt.err (!%p3213_p5)
}
  0x67   :  { %77 = dma.hbm_to_vmem [thread:$0]  %s3869_s5, 256, %s3432_s12, [#allocation9], %s3299_s20, %s3299_s20, %s3300_s15  }
  0x68   :  { %s3303_s13 = smov [#allocation13]   ;;  %s3304_s4 = smov [#allocation14]  }
  0x69   :  { %s96_s14 = sshll.u32 %s3303_s13, 4  ;;  %s105_s16 = sshll.u32 %s3304_s4, 4  ;;  %s97_s14 = int_to_ptr.vmem [resolvable:$true] %s96_s14  ;;  %s3466_s16 = int_to_ptr.vmem [resolvable:$true] %s105_s16 }
  0x6a   :  { %s3217_s21 = scalar_lea.hbm %s3871_s7, 16 }
  0x6b   :  { %p3218_p6 = scmp.ne.s32.totalorder %s3871_s7, %s3217_s21  ;;  %p3221_p7 = scmp.lt.u32.totalorder %s3217_s21, %s3871_s7 }
  0x6d   :  { %p3223_p8 = pnand %p3221_p7, %p3218_p6 }
  0x6f   :  { %3226 = shalt.err (!%p3223_p8)
}
  0x70   :  { %s3227_s5 = scalar_lea.vmem %s97_s14, 16  ;;  %s3231_s12 = scalar_lea.vmem %s97_s14, 32 }
  0x71   :  { %p3228_p9 = scmp.ne.s32.totalorder %s97_s14, %s3227_s5  ;;  %p3232_p10 = scmp.lt.s32.totalorder %s97_s14, %s97_s14 }
  0x72   :  { %p3233_p11 = scmp.lt.s32.totalorder %s3231_s12, %s3227_s5 }
  0x74   :  { %p3234_p12 = por %p3233_p11, %p3232_p10 }
  0x76   :  { %p3235_p13 = pnand %p3234_p12, %p3228_p9 }
  0x78   :  { %3238 = shalt.err (!%p3235_p13)
}
  0x79   :  { %99 = dma.hbm_to_vmem [thread:$0]  %s3871_s7, 16, %s97_s14, [#allocation12]  }
  0x7a   :  { %s3239_s6 = scalar_lea.hbm %s3872_s8, 512 }
  0x7b   :  { %p3240_p0 = scmp.ne.s32.totalorder %s3872_s8, %s3239_s6  ;;  %p3243_p1 = scmp.lt.u32.totalorder %s3239_s6, %s3872_s8 }
  0x7d   :  { %p3245_p2 = pnand %p3243_p1, %p3240_p0 }
  0x7f   :  { %3248 = shalt.err (!%p3245_p2)
}
  0x80   :  { %s3249_s29 = scalar_lea.vmem %s3466_s16, 512  ;;  %p3254_p4 = scmp.lt.s32.totalorder %s3466_s16, %s3466_s16 }
  0x81   :  { %p3250_p3 = scmp.ne.s32.totalorder %s3466_s16, %s3249_s29  ;;  %p3255_p5 = scmp.lt.s32.totalorder %s3249_s29, %s3249_s29 }
  0x83   :  { %p3256_p6 = por %p3255_p5, %p3254_p4 }
  0x85   :  { %p3257_p7 = pnand %p3256_p6, %p3250_p3 }
  0x87   :  { %3260 = shalt.err (!%p3257_p7)
}
  0x88   :  { %111 = dma.hbm_to_vmem [thread:$0]  %s3872_s8, 512, %s3466_s16, [#allocation15], %s3299_s20, %s3299_s20, %s3300_s15  }
  0x89   :  { %3283 = dma.done.wait [#allocation3], 256  }
  0x8a   :  { %3284 = vsyncadd [#allocation3], 4294967040 }
  0x8b   :  { %3285 = dma.done.wait [#allocation6], 48  }
  0x8c   :  { %3286 = vsyncadd [#allocation6], 4294967248 }
  0x8d   :  { %3287 = dma.done.wait [#allocation9], 272  }
  0x8e   :  { %3288 = vsyncadd [#allocation9], 4294967024 }
  0x8f   :  { %3289 = dma.done.wait [#allocation12], 528  }
  0x90   :  { %3290 = vsyncadd [#allocation12], 4294966768 }
  0x91   :  { %3291 = dma.done.wait [#allocation15], 512  }
  0x92   :  { %3292 = vsyncadd [#allocation15], 4294966784  ;;  %v3305_v0 = vmov 0.0|0.0   ;;  %vm3306_vm0 = vmmov 0   ;;  %v3307_v1 = vmov 0.0   ;;  %vm184_vm1 = vcmask 130048  }
  0x93   :  { %2861 = vmatprep.subr.bf16.mxu1 %v3305_v0  ;;  %2601 = vmatprep.mubr.msk.f32.mxu1 %vm3306_vm0, %v3307_v1  ;;  %v140_v2 = vld [vmem:[#allocation10] sm:$0xff]  ;;  %v141_v3 = vld [vmem:[#allocation10 + $0x8] sm:$0xff]  ;;  %v146_v4 = vld [vmem:[#allocation11] sm:$0xff]  ;;  %vm307_vm2 = vcmask 261120   ;;  %vm269_vm3 = vcmask 1040384   ;;  %s3309_s15 = smov 32  }
  0x94   :  { %v2857_v5 = vpack.c.bf16 %v141_v3, %v140_v2  ;;  %v147_v6 = vld [vmem:[#allocation11 + $0x8] sm:$0xff]  ;;  %v176_v7 = vld [vmem:[#allocation2] sm:$0xff]  ;;  %v148_v9 = vld [vmem:[#allocation11 + $0x10] sm:$0xff]  ;;  %vm2411_vm4 = vcmask 254976  }
  0x95   :  { %v3503_v8 = vpack.c.bf16 %v147_v6, %v146_v4  ;;  %2590 = vmatprep.mubr.msk.f32.mxu0 %vm184_vm1, %v176_v7  ;;  %v149_v10 = vld [vmem:[#allocation11 + $0x18] sm:$0xff]  ;;  %v177_v11 = vld [vmem:[#allocation2 + $0x8] sm:$0xff]  ;;  %v2435_v14 = vld [vmem:[#allocation13] ss:$0 sm:$0xff] }
  0x96   :  { %2858 = vmatprep.subr.bf16.mxu0 %v2857_v5  ;;  %v3507_v12 = vpack.c.bf16 %v149_v10, %v148_v9  ;;  %v3516_v13 = vld [vmem:[%s3865_s1] sm:$0x3]  ;;  %v3551_v44 = vld [vmem:[#allocation7] ss:$0 sm:$0xff]  ;;  %v3553_v46 = vld [vmem:[#allocation8] ss:$0 sm:$0xff] }
  0x97   :  { %2860 = vmatpush3.bf16.msra.mxu0 %v2857_v5  ;;  %2863 = vmatpush3.bf16.msra.mxu1 %v3503_v8  ;;  %s3308_s1 = smov 64   ;;  %v306_v49 = vld [vmem:[#allocation5] sm:$0x3]  ;;  %v150_v56 = vld [vmem:[%s3873_s9] sm:$0xff]  ;;  %v151_v57 = vld [vmem:[%s3873_s9 + $0x8] sm:$0xff] }
  0x98   :  { %2864 = vmatprep.subr.bf16.mxu1 %v3305_v0  ;;  %2867 = vmatprep.subr.bf16.mxu0 %v3305_v0  ;;  %v152_v58 = vld [vmem:[%s3873_s9 + $0x10] sm:$0xff]  ;;  %v3575_v59 = vpack.c.bf16 %v151_v57, %v150_v56  ;;  %v153_v60 = vld [vmem:[%s3873_s9 + $0x18] sm:$0xff]  ;;  %v142_v62 = vld [vmem:[#allocation14] sm:$0xff] }
  0x99   :  { %v3581_v61 = vpack.c.bf16 %v153_v60, %v152_v58  ;;  %v143_v63 = vld [vmem:[#allocation14 + $0x8] sm:$0xff]  ;;  %v144_v3 = vld [vmem:[#allocation14 + $0x10] sm:$0xff]  ;;  %v145_v4 = vld [vmem:[#allocation14 + $0x18] sm:$0xff] }
  0x9a   :  { %2591 = vmatmul.mubr.msk.f32.vlgmr.msra.gmra.mrb[0].mxu0 %vm184_vm1, %v177_v11  ;;  %v3585_v2 = vpack.c.bf16 %v143_v63, %v142_v62  ;;  %v3592_v6 = vpack.c.bf16 %v145_v4, %v144_v3 }
  0x9b   :  { %2866 = vmatpush3.bf16.msra.mxu1 %v3507_v12  ;;  %2612 = vmatprep.mubr.msk.f32.mxu0 %vm3306_vm0, %v3307_v1 }
  0x9c   :  { %2873 = vmatprep.subr.bf16.mxu1 %v3305_v0  ;;  %2869 = vmatpush3.bf16.msra.mxu0 %v3575_v59 }
  0x9d   :  { %2870 = vmatprep.subr.bf16.mxu0 %v3305_v0 }
  0x9e   :  { %2602 = vmatmul.mubr.msk.f32.vlgmr.msra.gmra.mrb[0].mxu1 %vm307_vm2, %v3516_v13 }
  0x9f   :  { %2875 = vmatpush3.bf16.msra.mxu1 %v3503_v8  ;;  %2623 = vmatprep.mubr.msk.f32.mxu1 %vm3306_vm0, %v3307_v1 }
  0xa0   :  { %2876 = vmatprep.subr.bf16.mxu1 %v3305_v0  ;;  %2872 = vmatpush3.bf16.msra.mxu0 %v3581_v61 }
  0xa1   :  { %2879 = vmatprep.subr.bf16.mxu0 %v3305_v0 }
  0xa3   :  { %2878 = vmatpush3.bf16.msra.mxu1 %v3507_v12  ;;  %2613 = vmatmul.mubr.msk.f32.vlgmr.msra.gmra.mrb[2].mxu0 %vm307_vm2, %v3516_v13 }
  0xa4   :  { %2885 = vmatprep.subr.bf16.mxu1 %v3305_v0  ;;  %2881 = vmatpush3.bf16.msra.mxu0 %v3585_v2 }
  0xa5   :  { %2882 = vmatprep.subr.bf16.mxu0 %v3305_v0  ;;  %2634 = vmatprep.mubr.msk.f32.mxu0 %vm3306_vm0, %v3307_v1 }
  0xa8   :  { %2884 = vmatpush3.bf16.msra.mxu0 %v3592_v6 }
  0xa9   :  { %2891 = vmatprep.subr.bf16.mxu0 %v3305_v0 }
 0x16d   :  { %v2592_v15 = vpop.f32.mrb[0].mxu0 }
 0x16e   :  { %v263_v16 = vadd.f32 %v2592_v15, %v2435_v14  ;;  %v257_v17 = vpop.f32.mrb[1].mxu0  ;;  %v3617_v15 = vld [vmem:[%s3874_s10] ss:$0 sm:$0xff]  ;;  %s3310_s10 = smov [#allocation16]  }
 0x16f   :  { %v258_v18 = vadd.f32 %v2435_v14, %v257_v17  ;;  %s2419_s2 = sshll.u32 %s3310_s10, 4  ;;  %s2420_s2 = int_to_ptr.vmem [resolvable:$true] %s2419_s2 }
 0x170   :  { %v267_v19 = vrot.slane %v263_v16, 7  ;;  %v277_v20 = vrot.slane %v263_v16, 1  ;;  %v282_v21 = vrot.slane %v263_v16, 2  ;;  %v287_v22 = vrot.slane %v263_v16, 3  ;;  %s3261_s5 = scalar_lea.vmem %s2420_s2, 32  ;;  %p3266_p9 = scmp.lt.s32.totalorder %s2420_s2, %s2420_s2 }
 0x171   :  { %v377_v23 = vpop.f32.mrb[0].mxu1  ;;  %v272_v24 = vrot.slane %v258_v18, 1  ;;  %v275_v25 = vrot.slane %v258_v18, 2  ;;  %v280_v26 = vrot.slane %v258_v18, 3  ;;  %v285_v27 = vrot.slane %v258_v18, 4  ;;  %p3262_p8 = scmp.ne.s32.totalorder %s2420_s2, %s3261_s5  ;;  %p3267_p10 = scmp.lt.s32.totalorder %s3261_s5, %s3261_s5 }
 0x172   :  { %v270_v28 = vsel %vm269_vm3, %v258_v18, %v267_v19  ;;  %v2603_v29 = vpop.f32.mrb[1].mxu1  ;;  %v290_v30 = vrot.slane %v258_v18, 5  ;;  %v292_v31 = vrot.slane %v263_v16, 4  ;;  %v295_v32 = vrot.slane %v258_v18, 6 }
 0x173   :  { %v451_v33 = vadd.f32 %v377_v23, %v270_v28  ;;  %v3531_v34 = vsel %vm269_vm3, %v272_v24, %v263_v16  ;;  %v3534_v35 = vsel %vm269_vm3, %v275_v25, %v277_v20  ;;  %v3537_v36 = vsel %vm269_vm3, %v280_v26, %v282_v21  ;;  %p3268_p11 = por %p3267_p10, %p3266_p9 }
 0x174   :  { %v3540_v37 = vsel %vm269_vm3, %v285_v27, %v287_v22  ;;  %v3543_v38 = vsel %vm269_vm3, %v290_v30, %v292_v31  ;;  %v297_v39 = vrot.slane %v263_v16, 5  ;;  %v300_v40 = vrot.slane %v258_v18, 7 }
 0x175   :  { %3021 = vtanh.f32 %v451_v33  ;;  %v302_v41 = vrot.slane %v263_v16, 6  ;;  %p3269_p12 = pnand %p3268_p11, %p3262_p8 }
 0x176   :  { %v3546_v42 = vsel %vm269_vm3, %v295_v32, %v297_v39  ;;  %v447_v10 = vpop.f32.mrb[2].mxu0 }
 0x177   :  { %v3549_v43 = vsel %vm269_vm3, %v300_v40, %v302_v41  ;;  %v2614_v11 = vpop.f32.mrb[3].mxu0 }
 0x17f   :  { %v3022_v45 = vpop.eup %3021 }
 0x180   :  { %v453_v47 = vmul.f32 %v3022_v45, %v3551_v44 }
 0x182   :  { %v454_v48 = vadd.f32 %v3553_v46, %v453_v47 }
 0x184   :  { %461 = vrot.lane.b32.xlu0 %v454_v48, %s3308_s1 }
 0x188   :  { %456 = vrot.lane.b32.xlu0 %v306_v49, %s3309_s15 }
 0x1f6   :  { %v462_v50 = vpop.permute.xlu0 %461 }
 0x1f7   :  { %v464_v51 = vmul.f32 %v462_v50, %v454_v48 }
 0x1f9   :  { %466 = vrot.lane.b32.xlu1 %v464_v51, %s3309_s15 }
 0x1fa   :  { %v3560_v52 = vpop.permute.xlu0 %456 }
 0x1fb   :  { %v459_v53 = vmul.f32 %v3560_v52, %v454_v48 }
 0x26b   :  { %v467_v54 = vpop.permute.xlu1 %466 }
 0x26c   :  { %v3563_v55 = vadd.f32 %v467_v54, %v459_v53 }
 0x26e   :  { %3023 = vtanh.f32 %v3563_v55 }
 0x278   :  { %v3024_v5 = vpop.eup %3023 }
 0x279   :  { %472 = vrot.lane.b32.xlu1 %v3024_v5, %s3308_s1 }
 0x2eb   :  { %v473_v7 = vpop.permute.xlu1 %472 }
 0x2ec   :  { %v475_v9 = vmul.f32 %v473_v7, %v454_v48 }
 0x2ee   :  { %477 = vrot.lane.b32.xlu0 %v475_v9, %s3309_s15 }
 0x360   :  { %v478_v13 = vpop.permute.xlu0 %477 }
 0x361   :  { %2624 = vmatmul.mubr.msk.f32.vlgmr.msra.gmra.mrb[2].mxu1 %vm307_vm2, %v478_v13  ;;  %2635 = vmatmul.mubr.msk.f32.vlgmr.msra.gmra.mrb[4].mxu0 %vm307_vm2, %v478_v13 }
 0x362   :  { %2893 = vmatpush3.bf16.msra.mxu0 %v3503_v8  ;;  %2887 = vmatpush3.bf16.msra.mxu1 %v3575_v59 }
 0x363   :  { %2894 = vmatprep.subr.bf16.mxu0 %v3305_v0  ;;  %2888 = vmatprep.subr.bf16.mxu1 %v3305_v0 }
 0x364   :  { %2656 = vmatprep.mubr.msk.f32.mxu0 %vm3306_vm0, %v3307_v1  ;;  %2645 = vmatprep.mubr.msk.f32.mxu1 %vm3306_vm0, %v3307_v1 }
 0x366   :  { %2896 = vmatpush3.bf16.msra.mxu0 %v3507_v12  ;;  %2890 = vmatpush3.bf16.msra.mxu1 %v3581_v61 }
 0x367   :  { %2897 = vmatprep.subr.bf16.mxu1 %v3305_v0  ;;  %2903 = vmatprep.subr.bf16.mxu0 %v3305_v0 }
 0x434   :  { %v547_v14 = vpop.f32.mrb[2].mxu1  ;;  %v617_v16 = vpop.f32.mrb[4].mxu0 }
 0x435   :  { %v717_v17 = vadd.f32 %v547_v14, %v3531_v34  ;;  %v618_v18 = vadd.f32 %v617_v16, %v447_v10  ;;  %v2625_v19 = vpop.f32.mrb[3].mxu1  ;;  %v2636_v20 = vpop.f32.mrb[5].mxu0 }
 0x437   :  { %3025 = vtanh.f32 %v717_v17  ;;  %v621_v21 = vadd.f32 %v3617_v15, %v618_v18 }
 0x439   :  { %3027 = vtanh.f32 %v621_v21 }
 0x441   :  { %v3026_v22 = vpop.eup %3025 }
 0x442   :  { %v719_v23 = vmul.f32 %v3026_v22, %v3551_v44 }
 0x443   :  { %v3028_v24 = vpop.eup %3027 }
 0x444   :  { %v720_v25 = vadd.f32 %v3553_v46, %v719_v23  ;;  %v623_v26 = vmul.f32 %v3028_v24, %v3551_v44 }
 0x446   :  { %723 = vrot.lane.b32.xlu0 %v720_v25, %s3308_s1  ;;  %v624_v27 = vadd.f32 %v3553_v46, %v623_v26  ;;  %v721_v32 = vmul.f32 %v720_v25, %v3563_v55 }
 0x448   :  { %627 = vrot.lane.b32.xlu1 %v624_v27, %s3308_s1  ;;  %v625_v39 = vmul.f32 %v624_v27, %v3560_v52 }
 0x4b8   :  { %v724_v28 = vpop.permute.xlu0 %723 }
 0x4b9   :  { %v726_v29 = vmul.f32 %v724_v28, %v720_v25 }
 0x4ba   :  { %v628_v30 = vpop.permute.xlu1 %627 }
 0x4bb   :  { %v630_v31 = vmul.f32 %v628_v30, %v624_v27  ;;  %728 = vrot.lane.b32.xlu0 %v726_v29, %s3309_s15 }
 0x4bd   :  { %632 = vrot.lane.b32.xlu1 %v630_v31, %s3309_s15 }
 0x52d   :  { %v729_v33 = vpop.permute.xlu0 %728 }
 0x52e   :  { %v731_v34 = vadd.f32 %v729_v33, %v721_v32 }
 0x52f   :  { %v633_v40 = vpop.permute.xlu1 %632 }
 0x530   :  { %3029 = vtanh.f32 %v731_v34  ;;  %v635_v41 = vadd.f32 %v633_v40, %v625_v39 }
 0x532   :  { %3031 = vtanh.f32 %v635_v41 }
 0x53a   :  { %v3030_v45 = vpop.eup %3029 }
 0x53b   :  { %734 = vrot.lane.b32.xlu0 %v3030_v45, %s3308_s1 }
 0x53c   :  { %v3032_v47 = vpop.eup %3031 }
 0x53d   :  { %638 = vrot.lane.b32.xlu1 %v3032_v47, %s3308_s1 }
 0x5ad   :  { %v735_v48 = vpop.permute.xlu0 %734 }
 0x5ae   :  { %v737_v49 = vmul.f32 %v735_v48, %v720_v25 }
 0x5af   :  { %v639_v50 = vpop.permute.xlu1 %638 }
 0x5b0   :  { %v641_v51 = vmul.f32 %v639_v50, %v624_v27  ;;  %739 = vrot.lane.b32.xlu0 %v737_v49, %s3309_s15 }
 0x5b2   :  { %643 = vrot.lane.b32.xlu1 %v641_v51, %s3309_s15 }
 0x622   :  { %v740_v53 = vpop.permute.xlu0 %739 }
 0x623   :  { %2657 = vmatmul.mubr.msk.f32.vlgmr.msra.gmra.mrb[6].mxu0 %vm307_vm2, %v740_v53 }
 0x624   :  { %v644_v52 = vpop.permute.xlu1 %643  ;;  %2905 = vmatpush3.bf16.msra.mxu0 %v3575_v59  ;;  %2678 = vmatprep.mubr.msk.f32.mxu0 %vm3306_vm0, %v3307_v1 }
 0x625   :  { %2646 = vmatmul.mubr.msk.f32.vlgmr.msra.gmra.mrb[4].mxu1 %vm307_vm2, %v644_v52  ;;  %2906 = vmatprep.subr.bf16.mxu0 %v3305_v0 }
 0x626   :  { %2899 = vmatpush3.bf16.msra.mxu1 %v3585_v2  ;;  %2667 = vmatprep.mubr.msk.f32.mxu1 %vm3306_vm0, %v3307_v1 }
 0x627   :  { %2900 = vmatprep.subr.bf16.mxu1 %v3305_v0 }
 0x628   :  { %2908 = vmatpush3.bf16.msra.mxu0 %v3581_v61 }
 0x629   :  { %2915 = vmatprep.subr.bf16.mxu0 %v3305_v0 }
 0x62a   :  { %2902 = vmatpush3.bf16.msra.mxu1 %v3592_v6 }
 0x62b   :  { %2909 = vmatprep.subr.bf16.mxu1 %v3305_v0 }
 0x62d   :  { %2668 = vmatmul.mubr.msk.f32.vlgmr.msra.gmra.mrb[6].mxu1 %vm307_vm2, %v740_v53 }
 0x62e   :  { %2911 = vmatpush3.bf16.msra.mxu1 %v3503_v8  ;;  %2689 = vmatprep.mubr.msk.f32.mxu1 %vm3306_vm0, %v3307_v1 }
 0x62f   :  { %2912 = vmatprep.subr.bf16.mxu1 %v3305_v0 }
 0x632   :  { %2914 = vmatpush3.bf16.msra.mxu1 %v3507_v12 }
 0x633   :  { %2921 = vmatprep.subr.bf16.mxu1 %v3305_v0 }
 0x6f6   :  { %v809_v54 = vpop.f32.mrb[6].mxu0 }
 0x6f7   :  { %v979_v55 = vadd.f32 %v809_v54, %v3534_v35  ;;  %v2658_v56 = vpop.f32.mrb[7].mxu0 }
 0x6f8   :  { %v713_v57 = vpop.f32.mrb[4].mxu1 }
 0x6f9   :  { %3033 = vtanh.f32 %v979_v55  ;;  %v2647_v58 = vpop.f32.mrb[5].mxu1 }
 0x700   :  { %v879_v60 = vpop.f32.mrb[6].mxu1 }
 0x701   :  { %v880_v62 = vadd.f32 %v879_v60, %v713_v57  ;;  %v2669_v63 = vpop.f32.mrb[7].mxu1 }
 0x703   :  { %v3034_v3 = vpop.eup %3033  ;;  %v883_v4 = vadd.f32 %v3617_v15, %v880_v62 }
 0x704   :  { %v981_v5 = vmul.f32 %v3034_v3, %v3551_v44 }
 0x705   :  { %3035 = vtanh.f32 %v883_v4 }
 0x706   :  { %v982_v7 = vadd.f32 %v3553_v46, %v981_v5 }
 0x708   :  { %985 = vrot.lane.b32.xlu0 %v982_v7, %s3308_s1  ;;  %v983_v17 = vmul.f32 %v982_v7, %v731_v34 }
 0x70f   :  { %v3036_v9 = vpop.eup %3035 }
 0x710   :  { %v885_v35 = vmul.f32 %v3036_v9, %v3551_v44 }
 0x712   :  { %v886_v10 = vadd.f32 %v3553_v46, %v885_v35 }
 0x714   :  { %889 = vrot.lane.b32.xlu1 %v886_v10, %s3308_s1  ;;  %v887_v20 = vmul.f32 %v886_v10, %v635_v41 }
 0x77a   :  { %v986_v11 = vpop.permute.xlu0 %985 }
 0x77b   :  { %v988_v13 = vmul.f32 %v986_v11, %v982_v7 }
 0x77d   :  { %990 = vrot.lane.b32.xlu0 %v988_v13, %s3309_s15 }
 0x786   :  { %v890_v14 = vpop.permute.xlu1 %889 }
 0x787   :  { %v892_v16 = vmul.f32 %v890_v14, %v886_v10 }
 0x789   :  { %894 = vrot.lane.b32.xlu1 %v892_v16, %s3309_s15 }
 0x7ef   :  { %v991_v18 = vpop.permute.xlu0 %990 }
 0x7f0   :  { %v993_v19 = vadd.f32 %v991_v18, %v983_v17 }
 0x7f2   :  { %3037 = vtanh.f32 %v993_v19 }
 0x7fb   :  { %v895_v21 = vpop.permute.xlu1 %894 }
 0x7fc   :  { %v3038_v22 = vpop.eup %3037  ;;  %v897_v23 = vadd.f32 %v895_v21, %v887_v20 }
 0x7fd   :  { %996 = vrot.lane.b32.xlu0 %v3038_v22, %s3308_s1 }
 0x7fe   :  { %3039 = vtanh.f32 %v897_v23 }
 0x808   :  { %v3040_v24 = vpop.eup %3039 }
 0x809   :  { %900 = vrot.lane.b32.xlu1 %v3040_v24, %s3308_s1 }
 0x86f   :  { %v997_v25 = vpop.permute.xlu0 %996 }
 0x870   :  { %v999_v26 = vmul.f32 %v997_v25, %v982_v7 }
 0x872   :  { %1001 = vrot.lane.b32.xlu0 %v999_v26, %s3309_s15 }
 0x87b   :  { %v901_v27 = vpop.permute.xlu1 %900 }
 0x87c   :  { %v903_v28 = vmul.f32 %v901_v27, %v886_v10 }
 0x87e   :  { %905 = vrot.lane.b32.xlu1 %v903_v28, %s3309_s15 }
 0x8e4   :  { %v1002_v29 = vpop.permute.xlu0 %1001 }
 0x8e5   :  { %2690 = vmatmul.mubr.msk.f32.vlgmr.msra.gmra.mrb[8].mxu1 %vm307_vm2, %v1002_v29 }
 0x8e6   :  { %2923 = vmatpush3.bf16.msra.mxu1 %v3575_v59  ;;  %2711 = vmatprep.mubr.msk.f32.mxu1 %vm3306_vm0, %v3307_v1 }
 0x8e7   :  { %2924 = vmatprep.subr.bf16.mxu1 %v3305_v0 }
 0x8ea   :  { %2926 = vmatpush3.bf16.msra.mxu1 %v3581_v61 }
 0x8eb   :  { %2933 = vmatprep.subr.bf16.mxu1 %v3305_v0 }
 0x8f0   :  { %v906_v30 = vpop.permute.xlu1 %905 }
 0x8f1   :  { %2679 = vmatmul.mubr.msk.f32.vlgmr.msra.gmra.mrb[8].mxu0 %vm307_vm2, %v906_v30 }
 0x8f2   :  { %2917 = vmatpush3.bf16.msra.mxu0 %v3585_v2  ;;  %2700 = vmatprep.mubr.msk.f32.mxu0 %vm3306_vm0, %v3307_v1 }
 0x8f3   :  { %2918 = vmatprep.subr.bf16.mxu0 %v3305_v0 }
 0x8f6   :  { %2920 = vmatpush3.bf16.msra.mxu0 %v3592_v6 }
 0x8f7   :  { %2927 = vmatprep.subr.bf16.mxu0 %v3305_v0 }
 0x8f9   :  { %2701 = vmatmul.mubr.msk.f32.vlgmr.msra.gmra.mrb[10].mxu0 %vm307_vm2, %v1002_v29 }
 0x8fa   :  { %2929 = vmatpush3.bf16.msra.mxu0 %v3503_v8  ;;  %2722 = vmatprep.mubr.msk.f32.mxu0 %vm3306_vm0, %v3307_v1 }
 0x8fb   :  { %2930 = vmatprep.subr.bf16.mxu0 %v3305_v0 }
 0x8fe   :  { %2932 = vmatpush3.bf16.msra.mxu0 %v3507_v12 }
 0x8ff   :  { %2939 = vmatprep.subr.bf16.mxu0 %v3305_v0 }
 0x9b8   :  { %v1071_v31 = vpop.f32.mrb[8].mxu1 }
 0x9b9   :  { %v1241_v32 = vadd.f32 %v1071_v31, %v3537_v36  ;;  %v2691_v33 = vpop.f32.mrb[9].mxu1 }
 0x9bb   :  { %3041 = vtanh.f32 %v1241_v32 }
 0x9c4   :  { %v975_v34 = vpop.f32.mrb[8].mxu0 }
 0x9c5   :  { %v3042_v39 = vpop.eup %3041  ;;  %v2680_v40 = vpop.f32.mrb[9].mxu0 }
 0x9c6   :  { %v1243_v41 = vmul.f32 %v3042_v39, %v3551_v44 }
 0x9c8   :  { %v1244_v45 = vadd.f32 %v3553_v46, %v1243_v41 }
 0x9ca   :  { %1247 = vrot.lane.b32.xlu0 %v1244_v45, %s3308_s1  ;;  %v1245_v57 = vmul.f32 %v1244_v45, %v993_v19 }
 0x9cc   :  { %v1141_v47 = vpop.f32.mrb[10].mxu0 }
 0x9cd   :  { %v1142_v48 = vadd.f32 %v1141_v47, %v975_v34  ;;  %v2702_v49 = vpop.f32.mrb[11].mxu0 }
 0x9cf   :  { %v1145_v50 = vadd.f32 %v3617_v15, %v1142_v48 }
 0x9d1   :  { %3043 = vtanh.f32 %v1145_v50 }
 0x9db   :  { %v3044_v51 = vpop.eup %3043 }
 0x9dc   :  { %v1147_v36 = vmul.f32 %v3044_v51, %v3551_v44 }
 0x9de   :  { %v1148_v53 = vadd.f32 %v3553_v46, %v1147_v36 }
 0x9e0   :  { %1151 = vrot.lane.b32.xlu1 %v1148_v53, %s3308_s1  ;;  %v1149_v63 = vmul.f32 %v1148_v53, %v897_v23 }
 0xa3c   :  { %v1248_v52 = vpop.permute.xlu0 %1247 }
 0xa3d   :  { %v1250_v54 = vmul.f32 %v1248_v52, %v1244_v45 }
 0xa3f   :  { %1252 = vrot.lane.b32.xlu0 %v1250_v54, %s3309_s15 }
 0xa52   :  { %v1152_v55 = vpop.permute.xlu1 %1151 }
 0xa53   :  { %v1154_v56 = vmul.f32 %v1152_v55, %v1148_v53 }
 0xa55   :  { %1156 = vrot.lane.b32.xlu1 %v1154_v56, %s3309_s15 }
 0xab1   :  { %v1253_v58 = vpop.permute.xlu0 %1252 }
 0xab2   :  { %v1255_v60 = vadd.f32 %v1253_v58, %v1245_v57 }
 0xab4   :  { %3045 = vtanh.f32 %v1255_v60 }
 0xabe   :  { %v3046_v62 = vpop.eup %3045 }
 0xabf   :  { %1258 = vrot.lane.b32.xlu0 %v3046_v62, %s3308_s1 }
 0xac7   :  { %v1157_v3 = vpop.permute.xlu1 %1156 }
 0xac8   :  { %v1159_v4 = vadd.f32 %v1157_v3, %v1149_v63 }
 0xaca   :  { %3047 = vtanh.f32 %v1159_v4 }
 0xad4   :  { %v3048_v5 = vpop.eup %3047 }
 0xad5   :  { %1162 = vrot.lane.b32.xlu1 %v3048_v5, %s3308_s1 }
 0xb31   :  { %v1259_v7 = vpop.permute.xlu0 %1258 }
 0xb32   :  { %v1261_v9 = vmul.f32 %v1259_v7, %v1244_v45 }
 0xb34   :  { %1263 = vrot.lane.b32.xlu0 %v1261_v9, %s3309_s15 }
 0xb47   :  { %v1163_v35 = vpop.permute.xlu1 %1162 }
 0xb48   :  { %v1165_v10 = vmul.f32 %v1163_v35, %v1148_v53 }
 0xb4a   :  { %1167 = vrot.lane.b32.xlu1 %v1165_v10, %s3309_s15 }
 0xba6   :  { %v1264_v11 = vpop.permute.xlu0 %1263 }
 0xba7   :  { %2723 = vmatmul.mubr.msk.f32.vlgmr.msra.gmra.mrb[12].mxu0 %vm307_vm2, %v1264_v11 }
 0xba8   :  { %2941 = vmatpush3.bf16.msra.mxu0 %v3575_v59  ;;  %2744 = vmatprep.mubr.msk.f32.mxu0 %vm3306_vm0, %v3307_v1 }
 0xba9   :  { %2942 = vmatprep.subr.bf16.mxu0 %v3305_v0 }
 0xbac   :  { %2944 = vmatpush3.bf16.msra.mxu0 %v3581_v61 }
 0xbad   :  { %2951 = vmatprep.subr.bf16.mxu0 %v3305_v0 }
 0xbbc   :  { %v1168_v13 = vpop.permute.xlu1 %1167 }
 0xbbd   :  { %2712 = vmatmul.mubr.msk.f32.vlgmr.msra.gmra.mrb[10].mxu1 %vm307_vm2, %v1168_v13 }
 0xbbe   :  { %2935 = vmatpush3.bf16.msra.mxu1 %v3585_v2  ;;  %2733 = vmatprep.mubr.msk.f32.mxu1 %vm3306_vm0, %v3307_v1 }
 0xbbf   :  { %2936 = vmatprep.subr.bf16.mxu1 %v3305_v0 }
 0xbc2   :  { %2938 = vmatpush3.bf16.msra.mxu1 %v3592_v6 }
 0xbc3   :  { %2945 = vmatprep.subr.bf16.mxu1 %v3305_v0 }
 0xbc5   :  { %2734 = vmatmul.mubr.msk.f32.vlgmr.msra.gmra.mrb[12].mxu1 %vm307_vm2, %v1264_v11 }
 0xbc6   :  { %2947 = vmatpush3.bf16.msra.mxu1 %v3503_v8  ;;  %2755 = vmatprep.mubr.msk.f32.mxu1 %vm3306_vm0, %v3307_v1 }
 0xbc7   :  { %2948 = vmatprep.subr.bf16.mxu1 %v3305_v0 }
 0xbca   :  { %2950 = vmatpush3.bf16.msra.mxu1 %v3507_v12 }
 0xbcb   :  { %2957 = vmatprep.subr.bf16.mxu1 %v3305_v0 }
 0xc7a   :  { %v1333_v14 = vpop.f32.mrb[12].mxu0 }
 0xc7b   :  { %v1503_v16 = vadd.f32 %v1333_v14, %v3540_v37  ;;  %v2724_v17 = vpop.f32.mrb[13].mxu0 }
 0xc7d   :  { %3049 = vtanh.f32 %v1503_v16 }
 0xc87   :  { %v3050_v18 = vpop.eup %3049 }
 0xc88   :  { %v1505_v19 = vmul.f32 %v3050_v18, %v3551_v44 }
 0xc8a   :  { %v1506_v20 = vadd.f32 %v3553_v46, %v1505_v19 }
 0xc8c   :  { %1509 = vrot.lane.b32.xlu0 %v1506_v20, %s3308_s1  ;;  %v1507_v33 = vmul.f32 %v1506_v20, %v1255_v60 }
 0xc90   :  { %v1237_v21 = vpop.f32.mrb[10].mxu1 }
 0xc91   :  { %v2713_v22 = vpop.f32.mrb[11].mxu1 }
 0xc98   :  { %v1403_v23 = vpop.f32.mrb[12].mxu1 }
 0xc99   :  { %v1404_v24 = vadd.f32 %v1403_v23, %v1237_v21  ;;  %v2735_v25 = vpop.f32.mrb[13].mxu1 }
 0xc9b   :  { %v1407_v26 = vadd.f32 %v3617_v15, %v1404_v24 }
 0xc9d   :  { %3051 = vtanh.f32 %v1407_v26 }
 0xca7   :  { %v3052_v27 = vpop.eup %3051 }
 0xca8   :  { %v1409_v37 = vmul.f32 %v3052_v27, %v3551_v44 }
 0xcaa   :  { %v1410_v28 = vadd.f32 %v3553_v46, %v1409_v37 }
 0xcac   :  { %1413 = vrot.lane.b32.xlu1 %v1410_v28, %s3308_s1  ;;  %v1411_v41 = vmul.f32 %v1410_v28, %v1159_v4 }
 0xcfe   :  { %v1510_v29 = vpop.permute.xlu0 %1509 }
 0xcff   :  { %v1512_v30 = vmul.f32 %v1510_v29, %v1506_v20 }
 0xd01   :  { %1514 = vrot.lane.b32.xlu0 %v1512_v30, %s3309_s15 }
 0xd1e   :  { %v1414_v31 = vpop.permute.xlu1 %1413 }
 0xd1f   :  { %v1416_v32 = vmul.f32 %v1414_v31, %v1410_v28 }
 0xd21   :  { %1418 = vrot.lane.b32.xlu1 %v1416_v32, %s3309_s15 }
 0xd73   :  { %v1515_v34 = vpop.permute.xlu0 %1514 }
 0xd74   :  { %v1517_v39 = vadd.f32 %v1515_v34, %v1507_v33 }
 0xd76   :  { %3053 = vtanh.f32 %v1517_v39 }
 0xd80   :  { %v3054_v40 = vpop.eup %3053 }
 0xd81   :  { %1520 = vrot.lane.b32.xlu0 %v3054_v40, %s3308_s1 }
 0xd93   :  { %v1419_v45 = vpop.permute.xlu1 %1418 }
 0xd94   :  { %v1421_v47 = vadd.f32 %v1419_v45, %v1411_v41 }
 0xd96   :  { %3055 = vtanh.f32 %v1421_v47 }
 0xda0   :  { %v3056_v48 = vpop.eup %3055 }
 0xda1   :  { %1424 = vrot.lane.b32.xlu1 %v3056_v48, %s3308_s1 }
 0xdf3   :  { %v1521_v49 = vpop.permute.xlu0 %1520 }
 0xdf4   :  { %v1523_v50 = vmul.f32 %v1521_v49, %v1506_v20 }
 0xdf6   :  { %1525 = vrot.lane.b32.xlu0 %v1523_v50, %s3309_s15 }
 0xe13   :  { %v1425_v51 = vpop.permute.xlu1 %1424 }
 0xe14   :  { %v1427_v36 = vmul.f32 %v1425_v51, %v1410_v28 }
 0xe16   :  { %1429 = vrot.lane.b32.xlu1 %v1427_v36, %s3309_s15 }
 0xe68   :  { %v1526_v53 = vpop.permute.xlu0 %1525 }
 0xe69   :  { %2756 = vmatmul.mubr.msk.f32.vlgmr.msra.gmra.mrb[14].mxu1 %vm307_vm2, %v1526_v53 }
 0xe6a   :  { %2959 = vmatpush3.bf16.msra.mxu1 %v3575_v59  ;;  %2777 = vmatprep.mubr.msk.f32.mxu1 %vm3306_vm0, %v3307_v1 }
 0xe6b   :  { %2960 = vmatprep.subr.bf16.mxu1 %v3305_v0 }
 0xe6e   :  { %2962 = vmatpush3.bf16.msra.mxu1 %v3581_v61 }
 0xe6f   :  { %2969 = vmatprep.subr.bf16.mxu1 %v3305_v0 }
 0xe88   :  { %v1430_v52 = vpop.permute.xlu1 %1429 }
 0xe89   :  { %2745 = vmatmul.mubr.msk.f32.vlgmr.msra.gmra.mrb[14].mxu0 %vm307_vm2, %v1430_v52 }
 0xe8a   :  { %2953 = vmatpush3.bf16.msra.mxu0 %v3585_v2  ;;  %2766 = vmatprep.mubr.msk.f32.mxu0 %vm3306_vm0, %v3307_v1 }
 0xe8b   :  { %2954 = vmatprep.subr.bf16.mxu0 %v3305_v0 }
 0xe8e   :  { %2956 = vmatpush3.bf16.msra.mxu0 %v3592_v6 }
 0xe8f   :  { %2963 = vmatprep.subr.bf16.mxu0 %v3305_v0 }
 0xe91   :  { %2767 = vmatmul.mubr.msk.f32.vlgmr.msra.gmra.mrb[16].mxu0 %vm307_vm2, %v1526_v53 }
 0xe92   :  { %2965 = vmatpush3.bf16.msra.mxu0 %v3503_v8  ;;  %2788 = vmatprep.mubr.msk.f32.mxu0 %vm3306_vm0, %v3307_v1 }
 0xe93   :  { %2966 = vmatprep.subr.bf16.mxu0 %v3305_v0 }
 0xe96   :  { %2968 = vmatpush3.bf16.msra.mxu0 %v3507_v12 }
 0xe97   :  { %2975 = vmatprep.subr.bf16.mxu0 %v3305_v0 }
 0xf3c   :  { %v1595_v54 = vpop.f32.mrb[14].mxu1 }
 0xf3d   :  { %v1765_v55 = vadd.f32 %v1595_v54, %v3543_v38  ;;  %v2757_v56 = vpop.f32.mrb[15].mxu1 }
 0xf3f   :  { %3057 = vtanh.f32 %v1765_v55 }
 0xf49   :  { %v3058_v57 = vpop.eup %3057 }
 0xf4a   :  { %v1767_v58 = vmul.f32 %v3058_v57, %v3551_v44 }
 0xf4c   :  { %v1768_v60 = vadd.f32 %v3553_v46, %v1767_v58 }
 0xf4e   :  { %1771 = vrot.lane.b32.xlu0 %v1768_v60, %s3308_s1  ;;  %v1769_v16 = vmul.f32 %v1768_v60, %v1517_v39 }
 0xf5c   :  { %v1499_v62 = vpop.f32.mrb[14].mxu0 }
 0xf5d   :  { %v2746_v63 = vpop.f32.mrb[15].mxu0 }
 0xf64   :  { %v1665_v3 = vpop.f32.mrb[16].mxu0 }
 0xf65   :  { %v1666_v4 = vadd.f32 %v1665_v3, %v1499_v62  ;;  %v2768_v5 = vpop.f32.mrb[17].mxu0 }
 0xf67   :  { %v1669_v7 = vadd.f32 %v3617_v15, %v1666_v4 }
 0xf69   :  { %3059 = vtanh.f32 %v1669_v7 }
 0xf73   :  { %v3060_v9 = vpop.eup %3059 }
 0xf74   :  { %v1671_v38 = vmul.f32 %v3060_v9, %v3551_v44 }
 0xf76   :  { %v1672_v35 = vadd.f32 %v3553_v46, %v1671_v38 }
 0xf78   :  { %1675 = vrot.lane.b32.xlu1 %v1672_v35, %s3308_s1  ;;  %v1673_v20 = vmul.f32 %v1672_v35, %v1421_v47 }
 0xfc0   :  { %v1772_v10 = vpop.permute.xlu0 %1771 }
 0xfc1   :  { %v1774_v11 = vmul.f32 %v1772_v10, %v1768_v60 }
 0xfc3   :  { %1776 = vrot.lane.b32.xlu0 %v1774_v11, %s3309_s15 }
 0xfea   :  { %v1676_v13 = vpop.permute.xlu1 %1675 }
 0xfeb   :  { %v1678_v14 = vmul.f32 %v1676_v13, %v1672_v35 }
 0xfed   :  { %1680 = vrot.lane.b32.xlu1 %v1678_v14, %s3309_s15 }
0x1035   :  { %v1777_v17 = vpop.permute.xlu0 %1776 }
0x1036   :  { %v1779_v18 = vadd.f32 %v1777_v17, %v1769_v16 }
0x1038   :  { %3061 = vtanh.f32 %v1779_v18 }
0x1042   :  { %v3062_v19 = vpop.eup %3061 }
0x1043   :  { %1782 = vrot.lane.b32.xlu0 %v3062_v19, %s3308_s1 }
0x105f   :  { %v1681_v21 = vpop.permute.xlu1 %1680 }
0x1060   :  { %v1683_v22 = vadd.f32 %v1681_v21, %v1673_v20 }
0x1062   :  { %3063 = vtanh.f32 %v1683_v22 }
0x106c   :  { %v3064_v23 = vpop.eup %3063 }
0x106d   :  { %1686 = vrot.lane.b32.xlu1 %v3064_v23, %s3308_s1 }
0x10b5   :  { %v1783_v24 = vpop.permute.xlu0 %1782 }
0x10b6   :  { %v1785_v25 = vmul.f32 %v1783_v24, %v1768_v60 }
0x10b8   :  { %1787 = vrot.lane.b32.xlu0 %v1785_v25, %s3309_s15 }
0x10df   :  { %v1687_v26 = vpop.permute.xlu1 %1686 }
0x10e0   :  { %v1689_v27 = vmul.f32 %v1687_v26, %v1672_v35 }
0x10e2   :  { %1691 = vrot.lane.b32.xlu1 %v1689_v27, %s3309_s15 }
0x112a   :  { %v1788_v37 = vpop.permute.xlu0 %1787 }
0x112b   :  { %2789 = vmatmul.mubr.msk.f32.vlgmr.msra.gmra.mrb[18].mxu0 %vm307_vm2, %v1788_v37 }
0x112c   :  { %2977 = vmatpush3.bf16.msra.mxu0 %v3575_v59  ;;  %2810 = vmatprep.mubr.msk.f32.mxu0 %vm3306_vm0, %v3307_v1 }
0x112d   :  { %2978 = vmatprep.subr.bf16.mxu0 %v3305_v0 }
0x1130   :  { %2980 = vmatpush3.bf16.msra.mxu0 %v3581_v61 }
0x1131   :  { %2987 = vmatprep.subr.bf16.mxu0 %v3305_v0 }
0x1154   :  { %v1692_v28 = vpop.permute.xlu1 %1691 }
0x1155   :  { %2778 = vmatmul.mubr.msk.f32.vlgmr.msra.gmra.mrb[16].mxu1 %vm307_vm2, %v1692_v28 }
0x1156   :  { %2971 = vmatpush3.bf16.msra.mxu1 %v3585_v2  ;;  %2799 = vmatprep.mubr.msk.f32.mxu1 %vm3306_vm0, %v3307_v1 }
0x1157   :  { %2972 = vmatprep.subr.bf16.mxu1 %v3305_v0 }
0x115a   :  { %2974 = vmatpush3.bf16.msra.mxu1 %v3592_v6 }
0x115b   :  { %2981 = vmatprep.subr.bf16.mxu1 %v3305_v0 }
0x115d   :  { %2800 = vmatmul.mubr.msk.f32.vlgmr.msra.gmra.mrb[18].mxu1 %vm307_vm2, %v1788_v37 }
0x115e   :  { %2983 = vmatpush3.bf16.msra.mxu1 %v3503_v8  ;;  %2821 = vmatprep.mubr.msk.f32.mxu1 %vm3306_vm0, %v3307_v1 }
0x115f   :  { %2984 = vmatprep.subr.bf16.mxu1 %v3305_v0 }
0x1162   :  { %2986 = vmatpush3.bf16.msra.mxu1 %v3507_v12 }
0x1163   :  { %2993 = vmatprep.subr.bf16.mxu1 %v3305_v0 }
0x11fe   :  { %v1857_v29 = vpop.f32.mrb[18].mxu0 }
0x11ff   :  { %v2027_v30 = vadd.f32 %v1857_v29, %v3546_v42  ;;  %v2790_v31 = vpop.f32.mrb[19].mxu0 }
0x1201   :  { %3065 = vtanh.f32 %v2027_v30 }
0x120b   :  { %v3066_v32 = vpop.eup %3065 }
0x120c   :  { %v2029_v33 = vmul.f32 %v3066_v32, %v3551_v44 }
0x120e   :  { %v2030_v34 = vadd.f32 %v3553_v46, %v2029_v33 }
0x1210   :  { %2033 = vrot.lane.b32.xlu0 %v2030_v34, %s3308_s1  ;;  %v2031_v53 = vmul.f32 %v2030_v34, %v1779_v18 }
0x1228   :  { %v1761_v8 = vpop.f32.mrb[16].mxu1 }
0x1229   :  { %v2779_v39 = vpop.f32.mrb[17].mxu1 }
0x1230   :  { %v1927_v40 = vpop.f32.mrb[18].mxu1 }
0x1231   :  { %v1928_v41 = vadd.f32 %v1927_v40, %v1761_v8  ;;  %v2801_v45 = vpop.f32.mrb[19].mxu1 }
0x1233   :  { %v1931_v12 = vadd.f32 %v3617_v15, %v1928_v41 }
0x1235   :  { %3067 = vtanh.f32 %v1931_v12 }
0x123f   :  { %v3068_v47 = vpop.eup %3067 }
0x1240   :  { %v1933_v42 = vmul.f32 %v3068_v47, %v3551_v44 }
0x1242   :  { %v1934_v48 = vadd.f32 %v3553_v46, %v1933_v42 }
0x1244   :  { %1937 = vrot.lane.b32.xlu1 %v1934_v48, %s3308_s1  ;;  %v1935_v56 = vmul.f32 %v1934_v48, %v1683_v22 }
0x1282   :  { %v2034_v49 = vpop.permute.xlu0 %2033 }
0x1283   :  { %v2036_v50 = vmul.f32 %v2034_v49, %v2030_v34 }
0x1285   :  { %2038 = vrot.lane.b32.xlu0 %v2036_v50, %s3309_s15 }
0x12b6   :  { %v1938_v51 = vpop.permute.xlu1 %1937 }
0x12b7   :  { %v1940_v36 = vmul.f32 %v1938_v51, %v1934_v48 }
0x12b9   :  { %1942 = vrot.lane.b32.xlu1 %v1940_v36, %s3309_s15 }
0x12f7   :  { %v2039_v52 = vpop.permute.xlu0 %2038 }
0x12f8   :  { %v2041_v54 = vadd.f32 %v2039_v52, %v2031_v53 }
0x12fa   :  { %3069 = vtanh.f32 %v2041_v54 }
0x1304   :  { %v3070_v55 = vpop.eup %3069 }
0x1305   :  { %2044 = vrot.lane.b32.xlu0 %v3070_v55, %s3308_s1 }
0x132b   :  { %v1943_v57 = vpop.permute.xlu1 %1942 }
0x132c   :  { %v1945_v58 = vadd.f32 %v1943_v57, %v1935_v56 }
0x132e   :  { %3071 = vtanh.f32 %v1945_v58 }
0x1338   :  { %v3072_v60 = vpop.eup %3071 }
0x1339   :  { %1948 = vrot.lane.b32.xlu1 %v3072_v60, %s3308_s1 }
0x1377   :  { %v2045_v62 = vpop.permute.xlu0 %2044 }
0x1378   :  { %v2047_v63 = vmul.f32 %v2045_v62, %v2030_v34 }
0x137a   :  { %2049 = vrot.lane.b32.xlu0 %v2047_v63, %s3309_s15 }
0x13ab   :  { %v1949_v3 = vpop.permute.xlu1 %1948 }
0x13ac   :  { %v1951_v4 = vmul.f32 %v1949_v3, %v1934_v48 }
0x13ae   :  { %1953 = vrot.lane.b32.xlu1 %v1951_v4, %s3309_s15 }
0x13ec   :  { %v2050_v5 = vpop.permute.xlu0 %2049 }
0x13ed   :  { %2822 = vmatmul.mubr.msk.f32.vlgmr.msra.gmra.mrb[20].mxu1 %vm307_vm2, %v2050_v5 }
0x13ee   :  { %2995 = vmatpush3.bf16.msra.mxu1 %v3575_v59  ;;  %2843 = vmatprep.mubr.msk.f32.mxu1 %vm3306_vm0, %v3307_v1 }
0x13ef   :  { %2996 = vmatprep.subr.bf16.mxu1 %v3305_v0 }
0x13f2   :  { %2998 = vmatpush3.bf16.msra.mxu1 %v3581_v61 }
0x1420   :  { %v1954_v7 = vpop.permute.xlu1 %1953 }
0x1421   :  { %2811 = vmatmul.mubr.msk.f32.vlgmr.msra.gmra.mrb[20].mxu0 %vm307_vm2, %v1954_v7 }
0x1422   :  { %2989 = vmatpush3.bf16.msra.mxu0 %v3585_v2  ;;  %2832 = vmatprep.mubr.msk.f32.mxu0 %vm3306_vm0, %v3307_v1 }
0x1423   :  { %2990 = vmatprep.subr.bf16.mxu0 %v3305_v0 }
0x1426   :  { %2992 = vmatpush3.bf16.msra.mxu0 %v3592_v6 }
0x1427   :  { %2999 = vmatprep.subr.bf16.mxu0 %v3305_v0 }
0x1429   :  { %2833 = vmatmul.mubr.msk.f32.vlgmr.msra.gmra.mrb[22].mxu0 %vm307_vm2, %v2050_v5 }
0x142a   :  { %3001 = vmatpush3.bf16.msra.mxu0 %v3585_v2  ;;  %2854 = vmatprep.mubr.msk.f32.mxu0 %vm3306_vm0, %v3307_v1 }
0x142b   :  { %3002 = vmatprep.subr.bf16.mxu0 %v3305_v0 }
0x142e   :  { %3004 = vmatpush3.bf16.msra.mxu0 %v3592_v6 }
0x14c0   :  { %v2119_v59 = vpop.f32.mrb[20].mxu1 }
0x14c1   :  { %v2289_v61 = vadd.f32 %v2119_v59, %v3549_v43  ;;  %v2823_v9 = vpop.f32.mrb[21].mxu1 }
0x14c3   :  { %3073 = vtanh.f32 %v2289_v61 }
0x14cd   :  { %v3074_v38 = vpop.eup %3073 }
0x14ce   :  { %v2291_v35 = vmul.f32 %v3074_v38, %v3551_v44 }
0x14d0   :  { %v2292_v10 = vadd.f32 %v3553_v46, %v2291_v35 }
0x14d2   :  { %2295 = vrot.lane.b32.xlu0 %v2292_v10, %s3308_s1  ;;  %v2293_v21 = vmul.f32 %v2292_v10, %v2041_v54 }
0x14f4   :  { %v2023_v2 = vpop.f32.mrb[20].mxu0 }
0x14f5   :  { %v2812_v11 = vpop.f32.mrb[21].mxu0 }
0x14fc   :  { %v2189_v13 = vpop.f32.mrb[22].mxu0 }
0x14fd   :  { %v2190_v1 = vadd.f32 %v2189_v13, %v2023_v2  ;;  %v2834_v14 = vpop.f32.mrb[23].mxu0 }
0x14ff   :  { %v2193_v0 = vadd.f32 %v3617_v15, %v2190_v1 }
0x1501   :  { %3075 = vtanh.f32 %v2193_v0 }
0x150b   :  { %v3076_v6 = vpop.eup %3075 }
0x150c   :  { %v2195_v43 = vmul.f32 %v3076_v6, %v3551_v44 }
0x150e   :  { %v2196_v16 = vadd.f32 %v3553_v46, %v2195_v43 }
0x1510   :  { %2199 = vrot.lane.b32.xlu1 %v2196_v16, %s3308_s1  ;;  %v2197_v25 = vmul.f32 %v2196_v16, %v1945_v58 }
0x1544   :  { %v2296_v17 = vpop.permute.xlu0 %2295 }
0x1545   :  { %v2298_v18 = vmul.f32 %v2296_v17, %v2292_v10 }
0x1547   :  { %2300 = vrot.lane.b32.xlu0 %v2298_v18, %s3309_s15 }
0x1582   :  { %v2200_v19 = vpop.permute.xlu1 %2199 }
0x1583   :  { %v2202_v20 = vmul.f32 %v2200_v19, %v2196_v16 }
0x1585   :  { %2204 = vrot.lane.b32.xlu1 %v2202_v20, %s3309_s15 }
0x15b9   :  { %v2301_v22 = vpop.permute.xlu0 %2300 }
0x15ba   :  { %v2303_v23 = vadd.f32 %v2301_v22, %v2293_v21 }
0x15bc   :  { %3077 = vtanh.f32 %v2303_v23 }
0x15c6   :  { %v3078_v24 = vpop.eup %3077 }
0x15c7   :  { %2306 = vrot.lane.b32.xlu0 %v3078_v24, %s3308_s1 }
0x15f7   :  { %v2205_v26 = vpop.permute.xlu1 %2204 }
0x15f8   :  { %v2207_v27 = vadd.f32 %v2205_v26, %v2197_v25 }
0x15fa   :  { %3079 = vtanh.f32 %v2207_v27 }
0x1604   :  { %v3080_v37 = vpop.eup %3079 }
0x1605   :  { %2210 = vrot.lane.b32.xlu1 %v3080_v37, %s3308_s1 }
0x1639   :  { %v2307_v28 = vpop.permute.xlu0 %2306 }
0x163a   :  { %v2309_v29 = vmul.f32 %v2307_v28, %v2292_v10 }
0x163c   :  { %2311 = vrot.lane.b32.xlu0 %v2309_v29, %s3309_s15 }
0x1677   :  { %v2211_v30 = vpop.permute.xlu1 %2210 }
0x1678   :  { %v2213_v31 = vmul.f32 %v2211_v30, %v2196_v16 }
0x167a   :  { %2215 = vrot.lane.b32.xlu1 %v2213_v31, %s3309_s15 }
0x16ae   :  { %v2312_v32 = vpop.permute.xlu0 %2311 }
0x16af   :  { %2855 = vmatmul.mubr.msk.f32.vlgmr.msra.gmra.mrb[24].mxu0 %vm307_vm2, %v2312_v32 }
0x16ec   :  { %v2216_v33 = vpop.permute.xlu1 %2215 }
0x16ed   :  { %2844 = vmatmul.mubr.msk.f32.vlgmr.msra.gmra.mrb[22].mxu1 %vm307_vm2, %v2216_v33 }
0x1782   :  { %v2381_v34 = vpop.f32.mrb[24].mxu0 }
0x1783   :  { %v2856_v8 = vpop.f32.mrb[25].mxu0 }
0x17c0   :  { %v2285_v39 = vpop.f32.mrb[22].mxu1 }
0x17c1   :  { %v2382_v40 = vadd.f32 %v2381_v34, %v2285_v39  ;;  %v2845_v41 = vpop.f32.mrb[23].mxu1 }
0x17c3   :  { %v2385_v45 = vadd.f32 %v3617_v15, %v2382_v40 }
0x17c5   :  { %3081 = vtanh.f32 %v2385_v45 }
0x17cf   :  { %v3082_v12 = vpop.eup %3081 }
0x17d0   :  { %v2387_v47 = vmul.f32 %v3082_v12, %v3551_v44 }
0x17d2   :  { %v2388_v42 = vadd.f32 %v3553_v46, %v2387_v47 }
0x17d4   :  { %2391 = vrot.lane.b32.xlu1 %v2388_v42, %s3308_s1  ;;  %v2389_v50 = vmul.f32 %v2388_v42, %v2207_v27 }
0x1846   :  { %v2392_v48 = vpop.permute.xlu1 %2391 }
0x1847   :  { %v2394_v49 = vmul.f32 %v2392_v48, %v2388_v42 }
0x1849   :  { %2396 = vrot.lane.b32.xlu0 %v2394_v49, %s3309_s15 }
0x18bb   :  { %v2397_v51 = vpop.permute.xlu0 %2396 }
0x18bc   :  { %v2399_v36 = vadd.f32 %v2397_v51, %v2389_v50 }
0x18be   :  { %3083 = vtanh.f32 %v2399_v36 }
0x18c8   :  { %v3084_v53 = vpop.eup %3083 }
0x18c9   :  { %2402 = vrot.lane.b32.xlu1 %v3084_v53, %s3308_s1 }
0x193b   :  { %v2403_v15 = vpop.permute.xlu1 %2402 }
0x193c   :  { %v2405_v52 = vmul.f32 %v2403_v15, %v2388_v42 }
0x193e   :  { %v2406_v54 = vmax.f32 %v2405_v52, 0.0 }
0x1940   :  { %2408 = vrot.lane.b32.xlu0 %v2406_v54, %s3309_s15 }
0x19b2   :  { %v2409_v44 = vpop.permute.xlu0 %2408 }
0x19b3   :  { %2412 = vst.msk [vmem:[#allocation16] sm:$0x3] %vm2411_vm4, %v2409_v44 }
0x19b4   :  { %3272 = shalt.err (!%p3269_p12)
}
0x19b5   :  { %s3273_s23 = scalar_lea.hbm %s3875_s11, 32 }
0x19b6   :  { %p3274_p13 = scmp.ne.s32.totalorder %s3875_s11, %s3273_s23  ;;  %p3277_p0 = scmp.lt.u32.totalorder %s3273_s23, %s3875_s11 }
0x19b8   :  { %p3279_p1 = pnand %p3277_p0, %p3274_p13 }
0x19ba   :  { %3282 = shalt.err (!%p3279_p1)
}
0x19bb   :  { %2422 = dma.vmem_to_hbm [thread:$0]  %s2420_s2, 32, %s3875_s11, [#allocation4]  }
0x19bc   :  { %3293 = dma.done.wait [#allocation4], 32  }
0x19bd   :  { %3294 = vsyncadd [#allocation4], 4294967264 }
0x19be   :  { %2426 = vsyncpa [#allocation3], 1 }
0x19bf   :  { %2427 = vsyncpa [#allocation6], 1 }
0x19c0   :  { %2428 = vsyncpa [#allocation9], 1 }
0x19c1   :  { %2429 = vsyncpa [#allocation12], 1 }
0x19c2   :  { %2430 = vsyncpa [#allocation15], 1 }
0x19c3   :  { %2431 = vsyncpa [#allocation4], 1 }

</bundles_post_ra>
